<compile_context>
chip_gen: v5e
topology: v5e:2x2
jax: 0.10.0
libtpu: 0.0.40
codegen_flags: <defaults>
</compile_context>

<pallas_src>
import functools

import jax
import jax.numpy as jnp
from jax import lax
from jax.experimental import pallas as pl
from jax.experimental.pallas import tpu as pltpu

EXPANSION = 4
BN_EPS = 1e-5
LANE = 128


def _round_up(x, m):
    return (x + m - 1) // m * m


# ------------------------------ Pallas kernel --------------------------------

def _bottleneck_kernel(*refs, Ho, Wo, stride, has_proj):
    """conv1+bn1+relu -> conv2(3x3)+bn2+relu -> conv3+bn3 (+shortcut) -> relu.

    BN scale is pre-folded into the bf16 conv weights, so BN here is bias-only.
    conv2 is 3 MXU matmuls with K = 3*P (kw taps stacked along the contraction).
    """
    if has_proj:
        (x_ref, w1_ref, b1_ref, w2_ref, b2_ref, w3_ref, b3_ref,
         ws_ref, bs_ref, o_ref, o1_ref) = refs
    else:
        (x_ref, w1_ref, b1_ref, w2_ref, b2_ref, w3_ref, b3_ref,
         o_ref, o1_ref) = refs
        ws_ref = bs_ref = None

    s = stride
    cin_p = x_ref.shape[-1]
    p_p = w2_ref.shape[-1]

    # ---- conv1 (1x1) + bn1(bias) + relu on the stride-parity layout of x ----
    x_all = x_ref[...]                                        # (s*s, Ho, Wo, Cin) bf16
    y1 = jnp.dot(x_all.reshape(s * s * Ho * Wo, cin_p), w1_ref[...],
                 preferred_element_type=jnp.float32)
    out1 = jnp.maximum(y1 + b1_ref[...], 0.0)                 # f32
    out1 = out1.reshape(s * s, Ho, Wo, p_p)

    # ---- stage out1 parity planes in a zero-halo VMEM scratch ----------------
    # Only the 1-element halo ring is (re)zeroed each step; the interior is fully
    # overwritten.  (A program_id==0 one-time init would be unsafe with a megacore
    # "parallel" grid: each core owns its own scratch.)
    zrow = jnp.zeros((1, Wo + 2, p_p), jnp.float32)
    zcol = jnp.zeros((Ho, 1, p_p), jnp.float32)
    for plane in range(s * s):
        o1_ref[plane, 0:1, :, :] = zrow
        o1_ref[plane, Ho + 1:Ho + 2, :, :] = zrow
        o1_ref[plane, 1:Ho + 1, 0:1, :] = zcol
        o1_ref[plane, 1:Ho + 1, Wo + 1:Wo + 2, :] = zcol
        o1_ref[plane, 1:Ho + 1, 1:Wo + 1, :] = out1[plane]
    # TODO(synk): bf16 scratch with kw taps pre-stacked along lanes (aligned stores,
    # pltpu.roll for the W shift) would further cut VMEM traffic / masked stores,
    # biggest effect on v5e; kept f32 + offset slices (the proven-safe pattern).

    # ---- conv2 (3x3, stride, pad=1) + bn2(bias) + relu -----------------------
    # 3 matmuls, one per kh tap, with the 3 kw taps concatenated along K = 3*P.
    acc = None
    for dh in range(3):
        pr = (dh - 1) % s                     # row parity of this tap
        oh = (dh - 1 - pr) // s               # row offset inside the parity plane
        parts = []
        for dw in range(3):
            pc = (dw - 1) % s
            ow = (dw - 1 - pc) // s
            parts.append(o1_ref[pr * s + pc,
                                1 + oh:1 + oh + Ho,
                                1 + ow:1 + ow + Wo, :])        # (Ho, Wo, P) f32
        patch = jnp.concatenate(parts, axis=-1)                # (Ho, Wo, 3P)
        patch = patch.reshape(Ho * Wo, 3 * p_p).astype(jnp.bfloat16)
        d = jnp.dot(patch, w2_ref[dh], preferred_element_type=jnp.float32)
        acc = d if acc is None else acc + d
    out2 = jnp.maximum(acc + b2_ref[...], 0.0).astype(jnp.bfloat16)

    # ---- conv3 (1x1) + bn3(bias) ---------------------------------------------
    y3 = jnp.dot(out2, w3_ref[...], preferred_element_type=jnp.float32) + b3_ref[...]

    # ---- shortcut: parity plane (0,0) of x IS x[:, ::s, ::s, :] --------------
    xs = x_all[0].reshape(Ho * Wo, cin_p)
    if has_proj:
        short = jnp.dot(xs, ws_ref[...], preferred_element_type=jnp.float32) + bs_ref[...]
    else:
        short = xs.astype(jnp.float32)        # identity shortcut (Cin_p == Co_p)

    # ---- residual add + relu, bf16 writeback ---------------------------------
    out = jnp.maximum(y3 + short, 0.0)
    o_ref[0] = out.reshape(Ho, Wo, out.shape[-1]).astype(o_ref.dtype)


# ------------------------------- wrapper --------------------------------------

def _fold_bn(params, name):
    g, b = params[name + "_gamma"], params[name + "_beta"]
    m, v = params[name + "_mean"], params[name + "_var"]
    scale = g / jnp.sqrt(v + BN_EPS)
    bias = b - m * scale
    return scale, bias


def _pad_bias(bias, c_pad):
    return jnp.pad(bias, (0, c_pad - bias.shape[0])).reshape(1, c_pad).astype(jnp.float32)


def _scaled_w(w_oi, scale, r_pad, c_pad):
    # (Cout, Cin) PyTorch layout -> (Cin, Cout) matmul layout; BN scale folded into
    # the output channels in f32 BEFORE the bf16 cast.
    w = w_oi.astype(jnp.float32).T * scale[None, :]
    r, c = w.shape
    return jnp.pad(w, ((0, r_pad - r), (0, c_pad - c))).astype(jnp.bfloat16)


def _const_index_map(ndim):
    def im(nb):
        return (0,) * ndim
    return im


def _const_spec(arr, single_buffer):
    if single_buffer:
        # Constant operand: index_map never changes, so double-buffering only burns
        # VMEM.  Only applied when the weight pool is big enough to matter.
        return pl.BlockSpec(arr.shape, _const_index_map(arr.ndim),
                            pipeline_mode=pl.Buffered(1))
    return pl.BlockSpec(arr.shape, _const_index_map(arr.ndim))


def bottleneck_forward(x_nchw, params, in_planes, planes, stride):
    assert stride in (1, 2), "TODO(synk): only stride 1/2 (the values ResNet uses)"
    out_planes = EXPANSION * planes
    has_proj = (stride != 1) or (in_planes != out_planes)

    n, cin, h, w_sp = x_nchw.shape
    assert cin == in_planes and h % stride == 0 and w_sp % stride == 0
    ho, wo = h // stride, w_sp // stride
    s = stride

    cin_p = _round_up(in_planes, LANE)
    p_p = _round_up(planes, LANE)
    co_p = _round_up(out_planes, LANE)

    # NCHW -> NHWC, channel-pad to a lane multiple, bf16, stride-parity layout
    # (N*s*s, Ho, Wo, Cin_p): all in-kernel accesses are contiguous static slices,
    # and parity plane 0 is exactly x[:, ::s, ::s, :] (the shortcut input).
    x = jnp.transpose(x_nchw, (0, 2, 3, 1))
    x = jnp.pad(x, ((0, 0), (0, 0), (0, 0), (0, cin_p - in_planes)))
    x = x.astype(jnp.bfloat16)
    x = x.reshape(n, ho, s, wo, s, cin_p).transpose(0, 2, 4, 1, 3, 5)
    x = x.reshape(n * s * s, ho, wo, cin_p)

    # BN folded: scale -> conv weights (f32 multiply, then bf16); bias kept f32.
    sc1, bi1 = _fold_bn(params, "bn1")
    sc2, bi2 = _fold_bn(params, "bn2")
    sc3, bi3 = _fold_bn(params, "bn3")

    w1 = _scaled_w(params["conv1_w"].reshape(planes, in_planes), sc1, cin_p, p_p)
    b1 = _pad_bias(bi1, p_p)
    # conv2: (O, I, kh, kw) -> (kh, kw, I, O), scale O, pad, stack kw along K.
    w2 = jnp.transpose(params["conv2_w"], (2, 3, 1, 0)).astype(jnp.float32)
    w2 = w2 * sc2[None, None, None, :]
    w2 = jnp.pad(w2, ((0, 0), (0, 0), (0, p_p - planes), (0, p_p - planes)))
    w2 = w2.reshape(3, 3 * p_p, p_p).astype(jnp.bfloat16)
    b2 = _pad_bias(bi2, p_p)
    w3 = _scaled_w(params["conv3_w"].reshape(out_planes, planes), sc3, p_p, co_p)
    b3 = _pad_bias(bi3, co_p)

    args = [x, w1, b1, w2, b2, w3, b3]
    if has_proj:
        scs, bis = _fold_bn(params, "bns")
        ws = _scaled_w(params["convs_w"].reshape(out_planes, in_planes), scs, cin_p, co_p)
        bs = _pad_bias(bis, co_p)
        args += [ws, bs]

    const_bytes = sum(int(a.size) * a.dtype.itemsize for a in args[1:])
    single_buffer_consts = const_bytes > (4 << 20)

    in_specs = [pl.BlockSpec((s * s, ho, wo, cin_p), lambda nb: (nb, 0, 0, 0))]
    in_specs += [_const_spec(a, single_buffer_consts) for a in args[1:]]
    out_spec = pl.BlockSpec((1, ho, wo, co_p), lambda nb: (nb, 0, 0, 0))

    # VMEM budget from actual operand sizes, capped below physical VMEM.
    x_block = s * s * ho * wo * cin_p * 2
    out_block = ho * wo * co_p * 2
    scratch_bytes = s * s * (ho + 2) * (wo + 2) * p_p * 4
    vmem_need = (2 * x_block + 2 * out_block + scratch_bytes
                 + const_bytes * (1 if single_buffer_consts else 2) + (4 << 20))
    try:
        vmem_cap = int(pltpu.get_tpu_info().vmem_capacity_bytes) - (8 << 20)
    except Exception:
        vmem_cap = 56 << 20
    vmem_limit = int(min(vmem_cap, max(vmem_need, 16 << 20)))

    flops = 2 * n * ho * wo * (s * s * cin_p * p_p          # conv1 (all parities)
                               + 3 * (3 * p_p) * p_p        # conv2 (3 K-stacked dots)
                               + p_p * co_p                 # conv3
                               + (cin_p * co_p if has_proj else 0))
    bytes_accessed = int(sum(int(a.size) * a.dtype.itemsize for a in args)
                         + n * ho * wo * co_p * 2)
    cost = pl.CostEstimate(flops=int(flops), transcendentals=0,
                           bytes_accessed=bytes_accessed)

    kernel = functools.partial(_bottleneck_kernel, Ho=ho, Wo=wo,
                               stride=s, has_proj=has_proj)

    out = pl.pallas_call(
        kernel,
        out_shape=jax.ShapeDtypeStruct((n, ho, wo, co_p), jnp.bfloat16),
        grid_spec=pltpu.PrefetchScalarGridSpec(
            num_scalar_prefetch=0,
            grid=(n,),
            in_specs=in_specs,
            out_specs=out_spec,
            scratch_shapes=[pltpu.VMEM((s * s, ho + 2, wo + 2, p_p), jnp.float32)]),
        compiler_params=pltpu.CompilerParams(
            dimension_semantics=("parallel",),
            vmem_limit_bytes=vmem_limit),
        cost_estimate=cost,
    )(*args)

    # drop channel padding, back to NCHW (in bf16), restore the module's f32 dtype.
    out = jnp.transpose(out[..., :out_planes], (0, 3, 1, 2))
    return out.astype(jnp.float32)


# --------------------------- parameters & reference ---------------------------

def init_bottleneck_params(key, in_planes, planes):
    out_planes = EXPANSION * planes
    ks = jax.random.split(key, 20)
    p = {}
    p["conv1_w"] = 0.1 * jax.random.normal(ks[0], (planes, in_planes, 1, 1), jnp.float32)
    p["conv2_w"] = 0.1 * jax.random.normal(ks[1], (planes, planes, 3, 3), jnp.float32)
    p["conv3_w"] = 0.1 * jax.random.normal(ks[2], (out_planes, planes, 1, 1), jnp.float32)
    p["convs_w"] = 0.1 * jax.random.normal(ks[3], (out_planes, in_planes, 1, 1), jnp.float32)
    for i, (name, c) in enumerate((("bn1", planes), ("bn2", planes),
                                   ("bn3", out_planes), ("bns", out_planes))):
        k0 = 4 + 4 * i
        p[name + "_gamma"] = 1.0 + 0.1 * jax.random.normal(ks[k0], (c,), jnp.float32)
        p[name + "_beta"] = 0.1 * jax.random.normal(ks[k0 + 1], (c,), jnp.float32)
        p[name + "_mean"] = 0.1 * jax.random.normal(ks[k0 + 2], (c,), jnp.float32)
        p[name + "_var"] = (0.5 + 0.5 * jax.random.uniform(ks[k0 + 3], (c,))).astype(jnp.float32)
    return p


def bottleneck_reference(x, p, in_planes, planes, stride):
    out_planes = EXPANSION * planes
    has_shortcut = (stride != 1) or (in_planes != out_planes)

    def conv(x, w, s, pad):
        return lax.conv_general_dilated(
            x, w, (s, s), [(pad, pad), (pad, pad)],
            dimension_numbers=("NCHW", "OIHW", "NCHW"))

    def bn(x, name):
        g, b = p[name + "_gamma"], p[name + "_beta"]
        m, v = p[name + "_mean"], p[name + "_var"]
        inv = g / jnp.sqrt(v + BN_EPS)
        return x * inv[None, :, None, None] + (b - m * inv)[None, :, None, None]

    out = jax.nn.relu(bn(conv(x, p["conv1_w"], 1, 0), "bn1"))
    out = jax.nn.relu(bn(conv(out, p["conv2_w"], stride, 1), "bn2"))
    out = bn(conv(out, p["conv3_w"], 1, 0), "bn3")
    short = bn(conv(x, p["convs_w"], stride, 0), "bns") if has_shortcut else x
    return jax.nn.relu(out + short)


# ----------------------------------- main --------------------------------------

def _run_case(key, n, h, w, in_planes, planes, stride):
    kx, kp = jax.random.split(key)
    x = jax.random.normal(kx, (n, in_planes, h, w), jnp.float32)   # NCHW like PyTorch
    params = init_bottleneck_params(kp, in_planes, planes)
    fwd = jax.jit(bottleneck_forward, static_argnums=(2, 3, 4))
    out = jax.block_until_ready(fwd(x, params, in_planes, planes, stride))
    ref = jax.block_until_ready(bottleneck_reference(x, params, in_planes, planes, stride))
    assert out.shape == ref.shape == (n, EXPANSION * planes, h // stride, w // stride)
    err = float(jnp.max(jnp.abs(out - ref)))
    assert jnp.allclose(out, ref, rtol=3e-2, atol=3e-2), f"mismatch vs reference (max abs err {err})"


if __name__ == "__main__":
    key = jax.random.PRNGKey(0)
    k1, k2 = jax.random.split(key)
    # projection shortcut, stride 2 (exercises the parity / space-to-depth path)
    _run_case(k1, n=2, h=16, w=16, in_planes=8, planes=4, stride=2)
    # identity shortcut, stride 1
    _run_case(k2, n=2, h=8, w=8, in_planes=16, planes=4, stride=1)
    print("KERNEL_OK")
</pallas_src>

<mosaic_0001>
module attributes {stable_mosaic.version = 11 : i64} {
  func.func @_bottleneck_kernel(%arg0: i32, %arg1: memref<4x8x8x128xbf16, #tpu.memory_space<vmem>>, %arg2: memref<128x128xbf16, #tpu.memory_space<vmem>>, %arg3: memref<1x128xf32, #tpu.memory_space<vmem>>, %arg4: memref<3x384x128xbf16, #tpu.memory_space<vmem>>, %arg5: memref<1x128xf32, #tpu.memory_space<vmem>>, %arg6: memref<128x128xbf16, #tpu.memory_space<vmem>>, %arg7: memref<1x128xf32, #tpu.memory_space<vmem>>, %arg8: memref<128x128xbf16, #tpu.memory_space<vmem>>, %arg9: memref<1x128xf32, #tpu.memory_space<vmem>>, %arg10: memref<1x8x8x128xbf16, #tpu.memory_space<vmem>>, %arg11: memref<4x10x10x128xf32, #tpu.memory_space<vmem>>) attributes {dimension_semantics = [#tpu.dimension_semantics<parallel>], iteration_bounds = array<i64: 2>, scalar_prefetch = 0 : i64, scratch_operands = 1 : i64, tpu.core_type = #tpu.core_type<tc>, window_params = [{transform_indices = @transform_0, window_bounds = array<i64: 4, 8, 8, 128>}, {pipeline_mode = #tpu.pipeline_mode<synchronous>, transform_indices = @transform_1, window_bounds = array<i64: 128, 128>}, {pipeline_mode = #tpu.pipeline_mode<synchronous>, transform_indices = @transform_2, window_bounds = array<i64: 1, 128>}, {pipeline_mode = #tpu.pipeline_mode<synchronous>, transform_indices = @transform_3, window_bounds = array<i64: 3, 384, 128>}, {pipeline_mode = #tpu.pipeline_mode<synchronous>, transform_indices = @transform_4, window_bounds = array<i64: 1, 128>}, {pipeline_mode = #tpu.pipeline_mode<synchronous>, transform_indices = @transform_5, window_bounds = array<i64: 128, 128>}, {pipeline_mode = #tpu.pipeline_mode<synchronous>, transform_indices = @transform_6, window_bounds = array<i64: 1, 128>}, {pipeline_mode = #tpu.pipeline_mode<synchronous>, transform_indices = @transform_7, window_bounds = array<i64: 128, 128>}, {pipeline_mode = #tpu.pipeline_mode<synchronous>, transform_indices = @transform_8, window_bounds = array<i64: 1, 128>}, {transform_indices = @transform_9, window_bounds = array<i64: 1, 8, 8, 128>}]} {
    %c0 = arith.constant 0 : index
    %c0_0 = arith.constant 0 : index
    %c0_1 = arith.constant 0 : index
    %c0_2 = arith.constant 0 : index
    %0 = vector.load %arg1[%c0, %c0_0, %c0_1, %c0_2] : memref<4x8x8x128xbf16, #tpu.memory_space<vmem>>, vector<4x8x8x128xbf16>
    %1 = vector.shape_cast %0 : vector<4x8x8x128xbf16> to vector<256x128xbf16>
    %c0_3 = arith.constant 0 : index
    %c0_4 = arith.constant 0 : index
    %2 = vector.load %arg2[%c0_3, %c0_4] : memref<128x128xbf16, #tpu.memory_space<vmem>>, vector<128x128xbf16>
    %cst = arith.constant dense<0.000000e+00> : vector<256x128xf32>
    %3 = tpu.matmul %1, %2, %cst {dimension_numbers = #tpu.dot_dimension_numbers<[1], [0], [0], [1], [0, 0, 1, 1], [], []>} : vector<256x128xbf16>, vector<128x128xbf16>, vector<256x128xf32> -> vector<256x128xf32>
    %c0_5 = arith.constant 0 : index
    %c0_6 = arith.constant 0 : index
    %4 = vector.load %arg3[%c0_5, %c0_6] : memref<1x128xf32, #tpu.memory_space<vmem>>, vector<1x128xf32>
    %5 = vector.broadcast %4 : vector<1x128xf32> to vector<256x128xf32>
    %6 = arith.addf %3, %5 : vector<256x128xf32>
    %cst_7 = arith.constant 0.000000e+00 : f32
    %7 = vector.broadcast %cst_7 : f32 to vector<256x128xf32>
    %8 = arith.maximumf %6, %7 : vector<256x128xf32>
    %9 = vector.shape_cast %8 : vector<256x128xf32> to vector<4x8x8x128xf32>
    %cst_8 = arith.constant 0.000000e+00 : f32
    %10 = vector.broadcast %cst_8 : f32 to vector<1x10x128xf32>
    %cst_9 = arith.constant 0.000000e+00 : f32
    %11 = vector.broadcast %cst_9 : f32 to vector<8x1x128xf32>
    %c0_10 = arith.constant 0 : index
    %c0_11 = arith.constant 0 : index
    %c0_12 = arith.constant 0 : index
    %c0_13 = arith.constant 0 : index
    %12 = vector.load %arg11[%c0_10, %c0_11, %c0_12, %c0_13] : memref<4x10x10x128xf32, #tpu.memory_space<vmem>>, vector<1x1x10x128xf32>
    %13 = vector.shape_cast %12 : vector<1x1x10x128xf32> to vector<1x10x128xf32>
    %14 = vector.shape_cast %10 : vector<1x10x128xf32> to vector<1x1x10x128xf32>
    tpu.vector_store %arg11[%c0_10, %c0_11, %c0_12, %c0_13], %14 {strides = array<i32>} : memref<4x10x10x128xf32, #tpu.memory_space<vmem>>, vector<1x1x10x128xf32>,
    %c0_14 = arith.constant 0 : index
    %c9 = arith.constant 9 : index
    %c0_15 = arith.constant 0 : index
    %c0_16 = arith.constant 0 : index
    %15 = vector.load %arg11[%c0_14, %c9, %c0_15, %c0_16] : memref<4x10x10x128xf32, #tpu.memory_space<vmem>>, vector<1x1x10x128xf32>
    %16 = vector.shape_cast %15 : vector<1x1x10x128xf32> to vector<1x10x128xf32>
    %17 = vector.shape_cast %10 : vector<1x10x128xf32> to vector<1x1x10x128xf32>
    tpu.vector_store %arg11[%c0_14, %c9, %c0_15, %c0_16], %17 {strides = array<i32>} : memref<4x10x10x128xf32, #tpu.memory_space<vmem>>, vector<1x1x10x128xf32>,
    %c0_17 = arith.constant 0 : index
    %c1 = arith.constant 1 : index
    %c0_18 = arith.constant 0 : index
    %c0_19 = arith.constant 0 : index
    %18 = vector.load %arg11[%c0_17, %c1, %c0_18, %c0_19] : memref<4x10x10x128xf32, #tpu.memory_space<vmem>>, vector<1x8x1x128xf32>
    %19 = vector.shape_cast %18 : vector<1x8x1x128xf32> to vector<8x1x128xf32>
    %20 = vector.shape_cast %11 : vector<8x1x128xf32> to vector<1x8x1x128xf32>
    tpu.vector_store %arg11[%c0_17, %c1, %c0_18, %c0_19], %20 {strides = array<i32>} : memref<4x10x10x128xf32, #tpu.memory_space<vmem>>, vector<1x8x1x128xf32>,
    %c0_20 = arith.constant 0 : index
    %c1_21 = arith.constant 1 : index
    %c9_22 = arith.constant 9 : index
    %c0_23 = arith.constant 0 : index
    %21 = vector.load %arg11[%c0_20, %c1_21, %c9_22, %c0_23] : memref<4x10x10x128xf32, #tpu.memory_space<vmem>>, vector<1x8x1x128xf32>
    %22 = vector.shape_cast %21 : vector<1x8x1x128xf32> to vector<8x1x128xf32>
    %23 = vector.shape_cast %11 : vector<8x1x128xf32> to vector<1x8x1x128xf32>
    tpu.vector_store %arg11[%c0_20, %c1_21, %c9_22, %c0_23], %23 {strides = array<i32>} : memref<4x10x10x128xf32, #tpu.memory_space<vmem>>, vector<1x8x1x128xf32>,
    %24 = vector.extract_strided_slice %9 {offsets = [0, 0, 0, 0], sizes = [1, 8, 8, 128], strides = [1, 1, 1, 1]} : vector<4x8x8x128xf32> to vector<1x8x8x128xf32>
    %25 = vector.shape_cast %24 : vector<1x8x8x128xf32> to vector<8x8x128xf32>
    %c0_24 = arith.constant 0 : index
    %c1_25 = arith.constant 1 : index
    %c1_26 = arith.constant 1 : index
    %c0_27 = arith.constant 0 : index
    %26 = vector.load %arg11[%c0_24, %c1_25, %c1_26, %c0_27] : memref<4x10x10x128xf32, #tpu.memory_space<vmem>>, vector<1x8x8x128xf32>
    %27 = vector.shape_cast %26 : vector<1x8x8x128xf32> to vector<8x8x128xf32>
    %28 = vector.shape_cast %25 : vector<8x8x128xf32> to vector<1x8x8x128xf32>
    tpu.vector_store %arg11[%c0_24, %c1_25, %c1_26, %c0_27], %28 {strides = array<i32>} : memref<4x10x10x128xf32, #tpu.memory_space<vmem>>, vector<1x8x8x128xf32>,
    %c1_28 = arith.constant 1 : index
    %c0_29 = arith.constant 0 : index
    %c0_30 = arith.constant 0 : index
    %c0_31 = arith.constant 0 : index
    %29 = vector.load %arg11[%c1_28, %c0_29, %c0_30, %c0_31] : memref<4x10x10x128xf32, #tpu.memory_space<vmem>>, vector<1x1x10x128xf32>
    %30 = vector.shape_cast %29 : vector<1x1x10x128xf32> to vector<1x10x128xf32>
    %31 = vector.shape_cast %10 : vector<1x10x128xf32> to vector<1x1x10x128xf32>
    tpu.vector_store %arg11[%c1_28, %c0_29, %c0_30, %c0_31], %31 {strides = array<i32>} : memref<4x10x10x128xf32, #tpu.memory_space<vmem>>, vector<1x1x10x128xf32>,
    %c1_32 = arith.constant 1 : index
    %c9_33 = arith.constant 9 : index
    %c0_34 = arith.constant 0 : index
    %c0_35 = arith.constant 0 : index
    %32 = vector.load %arg11[%c1_32, %c9_33, %c0_34, %c0_35] : memref<4x10x10x128xf32, #tpu.memory_space<vmem>>, vector<1x1x10x128xf32>
    %33 = vector.shape_cast %32 : vector<1x1x10x128xf32> to vector<1x10x128xf32>
    %34 = vector.shape_cast %10 : vector<1x10x128xf32> to vector<1x1x10x128xf32>
    tpu.vector_store %arg11[%c1_32, %c9_33, %c0_34, %c0_35], %34 {strides = array<i32>} : memref<4x10x10x128xf32, #tpu.memory_space<vmem>>, vector<1x1x10x128xf32>,
    %c1_36 = arith.constant 1 : index
    %c1_37 = arith.constant 1 : index
    %c0_38 = arith.constant 0 : index
    %c0_39 = arith.constant 0 : index
    %35 = vector.load %arg11[%c1_36, %c1_37, %c0_38, %c0_39] : memref<4x10x10x128xf32, #tpu.memory_space<vmem>>, vector<1x8x1x128xf32>
    %36 = vector.shape_cast %35 : vector<1x8x1x128xf32> to vector<8x1x128xf32>
    %37 = vector.shape_cast %11 : vector<8x1x128xf32> to vector<1x8x1x128xf32>
    tpu.vector_store %arg11[%c1_36, %c1_37, %c0_38, %c0_39], %37 {strides = array<i32>} : memref<4x10x10x128xf32, #tpu.memory_space<vmem>>, vector<1x8x1x128xf32>,
    %c1_40 = arith.constant 1 : index
    %c1_41 = arith.constant 1 : index
    %c9_42 = arith.constant 9 : index
    %c0_43 = arith.constant 0 : index
    %38 = vector.load %arg11[%c1_40, %c1_41, %c9_42, %c0_43] : memref<4x10x10x128xf32, #tpu.memory_space<vmem>>, vector<1x8x1x128xf32>
    %39 = vector.shape_cast %38 : vector<1x8x1x128xf32> to vector<8x1x128xf32>
    %40 = vector.shape_cast %11 : vector<8x1x128xf32> to vector<1x8x1x128xf32>
    tpu.vector_store %arg11[%c1_40, %c1_41, %c9_42, %c0_43], %40 {strides = array<i32>} : memref<4x10x10x128xf32, #tpu.memory_space<vmem>>, vector<1x8x1x128xf32>,
    %41 = vector.extract_strided_slice %9 {offsets = [1, 0, 0, 0], sizes = [1, 8, 8, 128], strides = [1, 1, 1, 1]} : vector<4x8x8x128xf32> to vector<1x8x8x128xf32>
    %42 = vector.shape_cast %41 : vector<1x8x8x128xf32> to vector<8x8x128xf32>
    %c1_44 = arith.constant 1 : index
    %c1_45 = arith.constant 1 : index
    %c1_46 = arith.constant 1 : index
    %c0_47 = arith.constant 0 : index
    %43 = vector.load %arg11[%c1_44, %c1_45, %c1_46, %c0_47] : memref<4x10x10x128xf32, #tpu.memory_space<vmem>>, vector<1x8x8x128xf32>
    %44 = vector.shape_cast %43 : vector<1x8x8x128xf32> to vector<8x8x128xf32>
    %45 = vector.shape_cast %42 : vector<8x8x128xf32> to vector<1x8x8x128xf32>
    tpu.vector_store %arg11[%c1_44, %c1_45, %c1_46, %c0_47], %45 {strides = array<i32>} : memref<4x10x10x128xf32, #tpu.memory_space<vmem>>, vector<1x8x8x128xf32>,
    %c2 = arith.constant 2 : index
    %c0_48 = arith.constant 0 : index
    %c0_49 = arith.constant 0 : index
    %c0_50 = arith.constant 0 : index
    %46 = vector.load %arg11[%c2, %c0_48, %c0_49, %c0_50] : memref<4x10x10x128xf32, #tpu.memory_space<vmem>>, vector<1x1x10x128xf32>
    %47 = vector.shape_cast %46 : vector<1x1x10x128xf32> to vector<1x10x128xf32>
    %48 = vector.shape_cast %10 : vector<1x10x128xf32> to vector<1x1x10x128xf32>
    tpu.vector_store %arg11[%c2, %c0_48, %c0_49, %c0_50], %48 {strides = array<i32>} : memref<4x10x10x128xf32, #tpu.memory_space<vmem>>, vector<1x1x10x128xf32>,
    %c2_51 = arith.constant 2 : index
    %c9_52 = arith.constant 9 : index
    %c0_53 = arith.constant 0 : index
    %c0_54 = arith.constant 0 : index
    %49 = vector.load %arg11[%c2_51, %c9_52, %c0_53, %c0_54] : memref<4x10x10x128xf32, #tpu.memory_space<vmem>>, vector<1x1x10x128xf32>
    %50 = vector.shape_cast %49 : vector<1x1x10x128xf32> to vector<1x10x128xf32>
    %51 = vector.shape_cast %10 : vector<1x10x128xf32> to vector<1x1x10x128xf32>
    tpu.vector_store %arg11[%c2_51, %c9_52, %c0_53, %c0_54], %51 {strides = array<i32>} : memref<4x10x10x128xf32, #tpu.memory_space<vmem>>, vector<1x1x10x128xf32>,
    %c2_55 = arith.constant 2 : index
    %c1_56 = arith.constant 1 : index
    %c0_57 = arith.constant 0 : index
    %c0_58 = arith.constant 0 : index
    %52 = vector.load %arg11[%c2_55, %c1_56, %c0_57, %c0_58] : memref<4x10x10x128xf32, #tpu.memory_space<vmem>>, vector<1x8x1x128xf32>
    %53 = vector.shape_cast %52 : vector<1x8x1x128xf32> to vector<8x1x128xf32>
    %54 = vector.shape_cast %11 : vector<8x1x128xf32> to vector<1x8x1x128xf32>
    tpu.vector_store %arg11[%c2_55, %c1_56, %c0_57, %c0_58], %54 {strides = array<i32>} : memref<4x10x10x128xf32, #tpu.memory_space<vmem>>, vector<1x8x1x128xf32>,
    %c2_59 = arith.constant 2 : index
    %c1_60 = arith.constant 1 : index
    %c9_61 = arith.constant 9 : index
    %c0_62 = arith.constant 0 : index
    %55 = vector.load %arg11[%c2_59, %c1_60, %c9_61, %c0_62] : memref<4x10x10x128xf32, #tpu.memory_space<vmem>>, vector<1x8x1x128xf32>
    %56 = vector.shape_cast %55 : vector<1x8x1x128xf32> to vector<8x1x128xf32>
    %57 = vector.shape_cast %11 : vector<8x1x128xf32> to vector<1x8x1x128xf32>
    tpu.vector_store %arg11[%c2_59, %c1_60, %c9_61, %c0_62], %57 {strides = array<i32>} : memref<4x10x10x128xf32, #tpu.memory_space<vmem>>, vector<1x8x1x128xf32>,
    %58 = vector.extract_strided_slice %9 {offsets = [2, 0, 0, 0], sizes = [1, 8, 8, 128], strides = [1, 1, 1, 1]} : vector<4x8x8x128xf32> to vector<1x8x8x128xf32>
    %59 = vector.shape_cast %58 : vector<1x8x8x128xf32> to vector<8x8x128xf32>
    %c2_63 = arith.constant 2 : index
    %c1_64 = arith.constant 1 : index
    %c1_65 = arith.constant 1 : index
    %c0_66 = arith.constant 0 : index
    %60 = vector.load %arg11[%c2_63, %c1_64, %c1_65, %c0_66] : memref<4x10x10x128xf32, #tpu.memory_space<vmem>>, vector<1x8x8x128xf32>
    %61 = vector.shape_cast %60 : vector<1x8x8x128xf32> to vector<8x8x128xf32>
    %62 = vector.shape_cast %59 : vector<8x8x128xf32> to vector<1x8x8x128xf32>
    tpu.vector_store %arg11[%c2_63, %c1_64, %c1_65, %c0_66], %62 {strides = array<i32>} : memref<4x10x10x128xf32, #tpu.memory_space<vmem>>, vector<1x8x8x128xf32>,
    %c3 = arith.constant 3 : index
    %c0_67 = arith.constant 0 : index
    %c0_68 = arith.constant 0 : index
    %c0_69 = arith.constant 0 : index
    %63 = vector.load %arg11[%c3, %c0_67, %c0_68, %c0_69] : memref<4x10x10x128xf32, #tpu.memory_space<vmem>>, vector<1x1x10x128xf32>
    %64 = vector.shape_cast %63 : vector<1x1x10x128xf32> to vector<1x10x128xf32>
    %65 = vector.shape_cast %10 : vector<1x10x128xf32> to vector<1x1x10x128xf32>
    tpu.vector_store %arg11[%c3, %c0_67, %c0_68, %c0_69], %65 {strides = array<i32>} : memref<4x10x10x128xf32, #tpu.memory_space<vmem>>, vector<1x1x10x128xf32>,
    %c3_70 = arith.constant 3 : index
    %c9_71 = arith.constant 9 : index
    %c0_72 = arith.constant 0 : index
    %c0_73 = arith.constant 0 : index
    %66 = vector.load %arg11[%c3_70, %c9_71, %c0_72, %c0_73] : memref<4x10x10x128xf32, #tpu.memory_space<vmem>>, vector<1x1x10x128xf32>
    %67 = vector.shape_cast %66 : vector<1x1x10x128xf32> to vector<1x10x128xf32>
    %68 = vector.shape_cast %10 : vector<1x10x128xf32> to vector<1x1x10x128xf32>
    tpu.vector_store %arg11[%c3_70, %c9_71, %c0_72, %c0_73], %68 {strides = array<i32>} : memref<4x10x10x128xf32, #tpu.memory_space<vmem>>, vector<1x1x10x128xf32>,
    %c3_74 = arith.constant 3 : index
    %c1_75 = arith.constant 1 : index
    %c0_76 = arith.constant 0 : index
    %c0_77 = arith.constant 0 : index
    %69 = vector.load %arg11[%c3_74, %c1_75, %c0_76, %c0_77] : memref<4x10x10x128xf32, #tpu.memory_space<vmem>>, vector<1x8x1x128xf32>
    %70 = vector.shape_cast %69 : vector<1x8x1x128xf32> to vector<8x1x128xf32>
    %71 = vector.shape_cast %11 : vector<8x1x128xf32> to vector<1x8x1x128xf32>
    tpu.vector_store %arg11[%c3_74, %c1_75, %c0_76, %c0_77], %71 {strides = array<i32>} : memref<4x10x10x128xf32, #tpu.memory_space<vmem>>, vector<1x8x1x128xf32>,
    %c3_78 = arith.constant 3 : index
    %c1_79 = arith.constant 1 : index
    %c9_80 = arith.constant 9 : index
    %c0_81 = arith.constant 0 : index
    %72 = vector.load %arg11[%c3_78, %c1_79, %c9_80, %c0_81] : memref<4x10x10x128xf32, #tpu.memory_space<vmem>>, vector<1x8x1x128xf32>
    %73 = vector.shape_cast %72 : vector<1x8x1x128xf32> to vector<8x1x128xf32>
    %74 = vector.shape_cast %11 : vector<8x1x128xf32> to vector<1x8x1x128xf32>
    tpu.vector_store %arg11[%c3_78, %c1_79, %c9_80, %c0_81], %74 {strides = array<i32>} : memref<4x10x10x128xf32, #tpu.memory_space<vmem>>, vector<1x8x1x128xf32>,
    %75 = vector.extract_strided_slice %9 {offsets = [3, 0, 0, 0], sizes = [1, 8, 8, 128], strides = [1, 1, 1, 1]} : vector<4x8x8x128xf32> to vector<1x8x8x128xf32>
    %76 = vector.shape_cast %75 : vector<1x8x8x128xf32> to vector<8x8x128xf32>
    %c3_82 = arith.constant 3 : index
    %c1_83 = arith.constant 1 : index
    %c1_84 = arith.constant 1 : index
    %c0_85 = arith.constant 0 : index
    %77 = vector.load %arg11[%c3_82, %c1_83, %c1_84, %c0_85] : memref<4x10x10x128xf32, #tpu.memory_space<vmem>>, vector<1x8x8x128xf32>
    %78 = vector.shape_cast %77 : vector<1x8x8x128xf32> to vector<8x8x128xf32>
    %79 = vector.shape_cast %76 : vector<8x8x128xf32> to vector<1x8x8x128xf32>
    tpu.vector_store %arg11[%c3_82, %c1_83, %c1_84, %c0_85], %79 {strides = array<i32>} : memref<4x10x10x128xf32, #tpu.memory_space<vmem>>, vector<1x8x8x128xf32>,
    %c3_86 = arith.constant 3 : index
    %c0_87 = arith.constant 0 : index
    %c0_88 = arith.constant 0 : index
    %c0_89 = arith.constant 0 : index
    %80 = vector.load %arg11[%c3_86, %c0_87, %c0_88, %c0_89] : memref<4x10x10x128xf32, #tpu.memory_space<vmem>>, vector<1x8x8x128xf32>
    %81 = vector.shape_cast %80 : vector<1x8x8x128xf32> to vector<8x8x128xf32>
    %c2_90 = arith.constant 2 : index
    %c0_91 = arith.constant 0 : index
    %c1_92 = arith.constant 1 : index
    %c0_93 = arith.constant 0 : index
    %82 = vector.load %arg11[%c2_90, %c0_91, %c1_92, %c0_93] : memref<4x10x10x128xf32, #tpu.memory_space<vmem>>, vector<1x8x8x128xf32>
    %83 = vector.shape_cast %82 : vector<1x8x8x128xf32> to vector<8x8x128xf32>
    %c3_94 = arith.constant 3 : index
    %c0_95 = arith.constant 0 : index
    %c1_96 = arith.constant 1 : index
    %c0_97 = arith.constant 0 : index
    %84 = vector.load %arg11[%c3_94, %c0_95, %c1_96, %c0_97] : memref<4x10x10x128xf32, #tpu.memory_space<vmem>>, vector<1x8x8x128xf32>
    %85 = vector.shape_cast %84 : vector<1x8x8x128xf32> to vector<8x8x128xf32>
    %86 = tpu.concatenate %81, %83, %85 in 2 : vector<8x8x128xf32>, vector<8x8x128xf32>, vector<8x8x128xf32> -> vector<8x8x384xf32>
    %87 = vector.shape_cast %86 : vector<8x8x384xf32> to vector<64x384xf32>
    %88 = arith.truncf %87 : vector<64x384xf32> to vector<64x384xbf16>
    %c0_98 = arith.constant 0 : index
    %c0_99 = arith.constant 0 : index
    %c0_100 = arith.constant 0 : index
    %89 = vector.load %arg4[%c0_98, %c0_99, %c0_100] : memref<3x384x128xbf16, #tpu.memory_space<vmem>>, vector<1x384x128xbf16>
    %90 = vector.shape_cast %89 : vector<1x384x128xbf16> to vector<384x128xbf16>
    %cst_101 = arith.constant dense<0.000000e+00> : vector<64x128xf32>
    %91 = tpu.matmul %88, %90, %cst_101 {dimension_numbers = #tpu.dot_dimension_numbers<[1], [0], [0], [1], [0, 0, 1, 1], [], []>} : vector<64x384xbf16>, vector<384x128xbf16>, vector<64x128xf32> -> vector<64x128xf32>
    %c1_102 = arith.constant 1 : index
    %c1_103 = arith.constant 1 : index
    %c0_104 = arith.constant 0 : index
    %c0_105 = arith.constant 0 : index
    %92 = vector.load %arg11[%c1_102, %c1_103, %c0_104, %c0_105] : memref<4x10x10x128xf32, #tpu.memory_space<vmem>>, vector<1x8x8x128xf32>
    %93 = vector.shape_cast %92 : vector<1x8x8x128xf32> to vector<8x8x128xf32>
    %c0_106 = arith.constant 0 : index
    %c1_107 = arith.constant 1 : index
    %c1_108 = arith.constant 1 : index
    %c0_109 = arith.constant 0 : index
    %94 = vector.load %arg11[%c0_106, %c1_107, %c1_108, %c0_109] : memref<4x10x10x128xf32, #tpu.memory_space<vmem>>, vector<1x8x8x128xf32>
    %95 = vector.shape_cast %94 : vector<1x8x8x128xf32> to vector<8x8x128xf32>
    %c1_110 = arith.constant 1 : index
    %c1_111 = arith.constant 1 : index
    %c1_112 = arith.constant 1 : index
    %c0_113 = arith.constant 0 : index
    %96 = vector.load %arg11[%c1_110, %c1_111, %c1_112, %c0_113] : memref<4x10x10x128xf32, #tpu.memory_space<vmem>>, vector<1x8x8x128xf32>
    %97 = vector.shape_cast %96 : vector<1x8x8x128xf32> to vector<8x8x128xf32>
    %98 = tpu.concatenate %93, %95, %97 in 2 : vector<8x8x128xf32>, vector<8x8x128xf32>, vector<8x8x128xf32> -> vector<8x8x384xf32>
    %99 = vector.shape_cast %98 : vector<8x8x384xf32> to vector<64x384xf32>
    %100 = arith.truncf %99 : vector<64x384xf32> to vector<64x384xbf16>
    %c1_114 = arith.constant 1 : index
    %c0_115 = arith.constant 0 : index
    %c0_116 = arith.constant 0 : index
    %101 = vector.load %arg4[%c1_114, %c0_115, %c0_116] : memref<3x384x128xbf16, #tpu.memory_space<vmem>>, vector<1x384x128xbf16>
    %102 = vector.shape_cast %101 : vector<1x384x128xbf16> to vector<384x128xbf16>
    %cst_117 = arith.constant dense<0.000000e+00> : vector<64x128xf32>
    %103 = tpu.matmul %100, %102, %cst_117 {dimension_numbers = #tpu.dot_dimension_numbers<[1], [0], [0], [1], [0, 0, 1, 1], [], []>} : vector<64x384xbf16>, vector<384x128xbf16>, vector<64x128xf32> -> vector<64x128xf32>
    %104 = arith.addf %91, %103 : vector<64x128xf32>
    %c3_118 = arith.constant 3 : index
    %c1_119 = arith.constant 1 : index
    %c0_120 = arith.constant 0 : index
    %c0_121 = arith.constant 0 : index
    %105 = vector.load %arg11[%c3_118, %c1_119, %c0_120, %c0_121] : memref<4x10x10x128xf32, #tpu.memory_space<vmem>>, vector<1x8x8x128xf32>
    %106 = vector.shape_cast %105 : vector<1x8x8x128xf32> to vector<8x8x128xf32>
    %c2_122 = arith.constant 2 : index
    %c1_123 = arith.constant 1 : index
    %c1_124 = arith.constant 1 : index
    %c0_125 = arith.constant 0 : index
    %107 = vector.load %arg11[%c2_122, %c1_123, %c1_124, %c0_125] : memref<4x10x10x128xf32, #tpu.memory_space<vmem>>, vector<1x8x8x128xf32>
    %108 = vector.shape_cast %107 : vector<1x8x8x128xf32> to vector<8x8x128xf32>
    %c3_126 = arith.constant 3 : index
    %c1_127 = arith.constant 1 : index
    %c1_128 = arith.constant 1 : index
    %c0_129 = arith.constant 0 : index
    %109 = vector.load %arg11[%c3_126, %c1_127, %c1_128, %c0_129] : memref<4x10x10x128xf32, #tpu.memory_space<vmem>>, vector<1x8x8x128xf32>
    %110 = vector.shape_cast %109 : vector<1x8x8x128xf32> to vector<8x8x128xf32>
    %111 = tpu.concatenate %106, %108, %110 in 2 : vector<8x8x128xf32>, vector<8x8x128xf32>, vector<8x8x128xf32> -> vector<8x8x384xf32>
    %112 = vector.shape_cast %111 : vector<8x8x384xf32> to vector<64x384xf32>
    %113 = arith.truncf %112 : vector<64x384xf32> to vector<64x384xbf16>
    %c2_130 = arith.constant 2 : index
    %c0_131 = arith.constant 0 : index
    %c0_132 = arith.constant 0 : index
    %114 = vector.load %arg4[%c2_130, %c0_131, %c0_132] : memref<3x384x128xbf16, #tpu.memory_space<vmem>>, vector<1x384x128xbf16>
    %115 = vector.shape_cast %114 : vector<1x384x128xbf16> to vector<384x128xbf16>
    %cst_133 = arith.constant dense<0.000000e+00> : vector<64x128xf32>
    %116 = tpu.matmul %113, %115, %cst_133 {dimension_numbers = #tpu.dot_dimension_numbers<[1], [0], [0], [1], [0, 0, 1, 1], [], []>} : vector<64x384xbf16>, vector<384x128xbf16>, vector<64x128xf32> -> vector<64x128xf32>
    %117 = arith.addf %104, %116 : vector<64x128xf32>
    %c0_134 = arith.constant 0 : index
    %c0_135 = arith.constant 0 : index
    %118 = vector.load %arg5[%c0_134, %c0_135] : memref<1x128xf32, #tpu.memory_space<vmem>>, vector<1x128xf32>
    %119 = vector.broadcast %118 : vector<1x128xf32> to vector<64x128xf32>
    %120 = arith.addf %117, %119 : vector<64x128xf32>
    %cst_136 = arith.constant 0.000000e+00 : f32
    %121 = vector.broadcast %cst_136 : f32 to vector<64x128xf32>
    %122 = arith.maximumf %120, %121 : vector<64x128xf32>
    %123 = arith.truncf %122 : vector<64x128xf32> to vector<64x128xbf16>
    %c0_137 = arith.constant 0 : index
    %c0_138 = arith.constant 0 : index
    %124 = vector.load %arg6[%c0_137, %c0_138] : memref<128x128xbf16, #tpu.memory_space<vmem>>, vector<128x128xbf16>
    %cst_139 = arith.constant dense<0.000000e+00> : vector<64x128xf32>
    %125 = tpu.matmul %123, %124, %cst_139 {dimension_numbers = #tpu.dot_dimension_numbers<[1], [0], [0], [1], [0, 0, 1, 1], [], []>} : vector<64x128xbf16>, vector<128x128xbf16>, vector<64x128xf32> -> vector<64x128xf32>
    %c0_140 = arith.constant 0 : index
    %c0_141 = arith.constant 0 : index
    %126 = vector.load %arg7[%c0_140, %c0_141] : memref<1x128xf32, #tpu.memory_space<vmem>>, vector<1x128xf32>
    %127 = vector.broadcast %126 : vector<1x128xf32> to vector<64x128xf32>
    %128 = arith.addf %125, %127 : vector<64x128xf32>
    %129 = vector.extract_strided_slice %0 {offsets = [0, 0, 0, 0], sizes = [1, 8, 8, 128], strides = [1, 1, 1, 1]} : vector<4x8x8x128xbf16> to vector<1x8x8x128xbf16>
    %130 = vector.shape_cast %129 : vector<1x8x8x128xbf16> to vector<8x8x128xbf16>
    %131 = vector.shape_cast %130 : vector<8x8x128xbf16> to vector<64x128xbf16>
    %c0_142 = arith.constant 0 : index
    %c0_143 = arith.constant 0 : index
    %132 = vector.load %arg8[%c0_142, %c0_143] : memref<128x128xbf16, #tpu.memory_space<vmem>>, vector<128x128xbf16>
    %cst_144 = arith.constant dense<0.000000e+00> : vector<64x128xf32>
    %133 = tpu.matmul %131, %132, %cst_144 {dimension_numbers = #tpu.dot_dimension_numbers<[1], [0], [0], [1], [0, 0, 1, 1], [], []>} : vector<64x128xbf16>, vector<128x128xbf16>, vector<64x128xf32> -> vector<64x128xf32>
    %c0_145 = arith.constant 0 : index
    %c0_146 = arith.constant 0 : index
    %134 = vector.load %arg9[%c0_145, %c0_146] : memref<1x128xf32, #tpu.memory_space<vmem>>, vector<1x128xf32>
    %135 = vector.broadcast %134 : vector<1x128xf32> to vector<64x128xf32>
    %136 = arith.addf %133, %135 : vector<64x128xf32>
    %137 = arith.addf %128, %136 : vector<64x128xf32>
    %cst_147 = arith.constant 0.000000e+00 : f32
    %138 = vector.broadcast %cst_147 : f32 to vector<64x128xf32>
    %139 = arith.maximumf %137, %138 : vector<64x128xf32>
    %140 = vector.shape_cast %139 : vector<64x128xf32> to vector<8x8x128xf32>
    %141 = arith.truncf %140 : vector<8x8x128xf32> to vector<8x8x128xbf16>
    %c0_148 = arith.constant 0 : index
    %c0_149 = arith.constant 0 : index
    %c0_150 = arith.constant 0 : index
    %c0_151 = arith.constant 0 : index
    %142 = vector.load %arg10[%c0_148, %c0_149, %c0_150, %c0_151] : memref<1x8x8x128xbf16, #tpu.memory_space<vmem>>, vector<1x8x8x128xbf16>
    %143 = vector.shape_cast %142 : vector<1x8x8x128xbf16> to vector<8x8x128xbf16>
    %144 = vector.shape_cast %141 : vector<8x8x128xbf16> to vector<1x8x8x128xbf16>
    tpu.vector_store %arg10[%c0_148, %c0_149, %c0_150, %c0_151], %144 {strides = array<i32>} : memref<1x8x8x128xbf16, #tpu.memory_space<vmem>>, vector<1x8x8x128xbf16>,
    return
  }
  func.func @transform_0(%arg0: i32) -> (i32, i32, i32, i32) {
    %c0_i32 = arith.constant 0 : i32
    %c0_i32_0 = arith.constant 0 : i32
    %c0_i32_1 = arith.constant 0 : i32
    %c0_i32_2 = arith.constant 0 : i32
    return %arg0, %c0_i32, %c0_i32_0, %c0_i32_1 : i32, i32, i32, i32
  }
  func.func @transform_1(%arg0: i32) -> (i32, i32) {
    %c0_i32 = arith.constant 0 : i32
    %c0_i32_0 = arith.constant 0 : i32
    %c0_i32_1 = arith.constant 0 : i32
    return %c0_i32, %c0_i32_0 : i32, i32
  }
  func.func @transform_2(%arg0: i32) -> (i32, i32) {
    %c0_i32 = arith.constant 0 : i32
    %c0_i32_0 = arith.constant 0 : i32
    %c0_i32_1 = arith.constant 0 : i32
    return %c0_i32, %c0_i32_0 : i32, i32
  }
  func.func @transform_3(%arg0: i32) -> (i32, i32, i32) {
    %c0_i32 = arith.constant 0 : i32
    %c0_i32_0 = arith.constant 0 : i32
    %c0_i32_1 = arith.constant 0 : i32
    %c0_i32_2 = arith.constant 0 : i32
    return %c0_i32, %c0_i32_0, %c0_i32_1 : i32, i32, i32
  }
  func.func @transform_4(%arg0: i32) -> (i32, i32) {
    %c0_i32 = arith.constant 0 : i32
    %c0_i32_0 = arith.constant 0 : i32
    %c0_i32_1 = arith.constant 0 : i32
    return %c0_i32, %c0_i32_0 : i32, i32
  }
  func.func @transform_5(%arg0: i32) -> (i32, i32) {
    %c0_i32 = arith.constant 0 : i32
    %c0_i32_0 = arith.constant 0 : i32
    %c0_i32_1 = arith.constant 0 : i32
    return %c0_i32, %c0_i32_0 : i32, i32
  }
  func.func @transform_6(%arg0: i32) -> (i32, i32) {
    %c0_i32 = arith.constant 0 : i32
    %c0_i32_0 = arith.constant 0 : i32
    %c0_i32_1 = arith.constant 0 : i32
    return %c0_i32, %c0_i32_0 : i32, i32
  }
  func.func @transform_7(%arg0: i32) -> (i32, i32) {
    %c0_i32 = arith.constant 0 : i32
    %c0_i32_0 = arith.constant 0 : i32
    %c0_i32_1 = arith.constant 0 : i32
    return %c0_i32, %c0_i32_0 : i32, i32
  }
  func.func @transform_8(%arg0: i32) -> (i32, i32) {
    %c0_i32 = arith.constant 0 : i32
    %c0_i32_0 = arith.constant 0 : i32
    %c0_i32_1 = arith.constant 0 : i32
    return %c0_i32, %c0_i32_0 : i32, i32
  }
  func.func @transform_9(%arg0: i32) -> (i32, i32, i32, i32) {
    %c0_i32 = arith.constant 0 : i32
    %c0_i32_0 = arith.constant 0 : i32
    %c0_i32_1 = arith.constant 0 : i32
    %c0_i32_2 = arith.constant 0 : i32
    return %arg0, %c0_i32, %c0_i32_0, %c0_i32_1 : i32, i32, i32, i32
  }
}

</mosaic_0001>

<bundles_post_ra>
// kernel: bottleneck_forward.1
= control target key start
LH: loop header
LB: loop body
LE: loop exit
PB: predicated region body
PF: predicated region fallthrough
CT: control target
= control target key end

     0   :  { %s2807_s30 = smov 0   ;;  %s3388_s0 = inlined_call_operand.vmem [shape: bf16[8,8,8,128], index: 0, kind: input, shape index: {}]   ;;  %s3389_s1 = inlined_call_operand.vmem [shape: bf16[128,128], index: 1, kind: input, shape index: {}]   ;;  %s3390_s2 = inlined_call_operand.vmem [shape: f32[1,128], index: 2, kind: input, shape index: {}]   ;;  %s3391_s3 = inlined_call_operand.vmem [shape: bf16[3,384,128], index: 3, kind: input, shape index: {}]   ;;  %s3392_s4 = inlined_call_operand.vmem [shape: f32[1,128], index: 4, kind: input, shape index: {}]   ;;  %s3393_s5 = inlined_call_operand.vmem [shape: bf16[128,128], index: 5, kind: input, shape index: {}]   ;;  %s3394_s6 = inlined_call_operand.vmem [shape: f32[1,128], index: 6, kind: input, shape index: {}]   ;;  %s3395_s7 = inlined_call_operand.vmem [shape: bf16[128,128], index: 7, kind: input, shape index: {}]   ;;  %s3396_s8 = inlined_call_operand.vmem [shape: f32[1,128], index: 8, kind: input, shape index: {}]   ;;  %s3397_s9 = inlined_call_operand.vmem [shape: bf16[2,8,8,128], index: 9, kind: output, shape index: {}]  }
   0x1 LB: > { %s2813_s10 = sadd.s32 4294967295, %s2754_s30   ;;  %p2042_p0 = scmp.ge.s32.totalorder %s2754_s30, 1  ;;  %s2754_s30 = sphi %s2807_s30, %s19_s30  }
   0x2   : > { %p289_p1 = scmp.lt.s32.totalorder %s2754_s30, 3 }
   0x4   : > { %p290_p2 = pnand %p2042_p0, %p289_p1 }
   0x5   : > { %s2043_s19 = sshll.u32 (!%p290_p2), %s2813_s10, 2  ;;  %p333_p4 = scmp.lt.s32.totalorder (!%p290_p2), %s2813_s10, 1 }
   0x6   : > { %293 = sbr.rel (%p290_p2) target bundleno = 776 (0x308), region = 56  ;;  %p327_p3 = scmp.lt.s32.totalorder (!%p290_p2), %s2043_s19, 7 }
   0xb   : > { %v2619_v0 = vld [vmem:[%s3389_s1 + $0x38] sm:$0xff]  ;;  %v2618_v1 = vld [vmem:[%s3389_s1 + $0x30] sm:$0xff]  ;;  %v2617_v2 = vld [vmem:[%s3389_s1 + $0x28] sm:$0xff]  ;;  %s3399_s19 = smov (!%p327_p3, %s2043_s19), 7  ;;  %s3401_s10 = smov (!%p333_p4, %s2813_s10), 1 }
   0xc   : > { %534 = vmatpush.bf16.msra.mxu0 %v2619_v0  ;;  %v2616_v3 = vld [vmem:[%s3389_s1 + $0x20] sm:$0xff]  ;;  %v2615_v4 = vld [vmem:[%s3389_s1 + $0x18] sm:$0xff]  ;;  %v2614_v5 = vld [vmem:[%s3389_s1 + $0x10] sm:$0xff]  ;;  %s2594_s26 = sshll.u32 %s3399_s19, 5  ;;  %s2595_s16 = sshll.u32 %s3401_s10, 5 }
   0xd   : > { %v2613_v6 = vld [vmem:[%s3389_s1 + $0x8] sm:$0xff]  ;;  %v2612_v7 = vld [vmem:[%s3389_s1] sm:$0xff]  ;;  %s2845_s12 = scalar_lea.vmem %s3388_s0, %s2594_s26  ;;  %v2659_v13 = vld [vmem:[%s3391_s3 + $0x138] sm:$0xff]  ;;  %s3379_s19 = scalar_lea.vmem %s3397_s9, %s2595_s16 }
   0xe   : > { %v2596_v8 = vld [vmem:[%s2845_s12] sm:$0xff]  ;;  %v2597_v9 = vld [vmem:[%s2845_s12 + $0x8] sm:$0xff]  ;;  %v2598_v10 = vld [vmem:[%s2845_s12 + $0x10] sm:$0xff]  ;;  %1120 = vmatpush.bf16.msra.mxu2 %v2659_v13 }
   0xf   : > { %v2599_v11 = vld [vmem:[%s2845_s12 + $0x18] sm:$0xff]  ;;  %v2600_v12 = vld [vmem:[%s2845_s12 + $0x20] sm:$0xff]  ;;  %v2601_v14 = vld [vmem:[%s2845_s12 + $0x28] sm:$0xff] }
  0x10   : > { %535 = vmatpush.bf16.msra.mxu0 %v2618_v1  ;;  %v2658_v15 = vld [vmem:[%s3391_s3 + $0x130] sm:$0xff]  ;;  %v2657_v16 = vld [vmem:[%s3391_s3 + $0x128] sm:$0xff]  ;;  %v2656_v17 = vld [vmem:[%s3391_s3 + $0x120] sm:$0xff] }
  0x11   : > { %v2655_v18 = vld [vmem:[%s3391_s3 + $0x118] sm:$0xff]  ;;  %v2602_v19 = vld [vmem:[%s2845_s12 + $0x30] sm:$0xff]  ;;  %v2653_v21 = vld [vmem:[%s3391_s3 + $0x108] sm:$0xff] }
  0x12   : > { %1121 = vmatpush.bf16.msra.mxu2 %v2658_v15  ;;  %v2654_v20 = vld [vmem:[%s3391_s3 + $0x110] sm:$0xff]  ;;  %v2652_v22 = vld [vmem:[%s3391_s3 + $0x100] sm:$0xff]  ;;  %v2603_v23 = vld [vmem:[%s2845_s12 + $0x38] sm:$0xff] }
  0x13   : > { %v2882_v24 = vld [vmem:[%s3390_s2] ss:$0 sm:$0xff]  ;;  %v2667_v33 = vld [vmem:[%s3391_s3 + $0x178] sm:$0xff]  ;;  %v2605_v34 = vld [vmem:[%s2845_s12 + $0x48] sm:$0xff] }
  0x14   : > { %536 = vmatpush.bf16.msra.mxu0 %v2617_v2  ;;  %v2604_v25 = vld [vmem:[%s2845_s12 + $0x40] sm:$0xff]  ;;  %1149 = vmatpush.bf16.msra.mxu3 %v2667_v33  ;;  %v2666_v37 = vld [vmem:[%s3391_s3 + $0x170] sm:$0xff]  ;;  %v2651_v39 = vld [vmem:[%s3391_s3 + $0xf8] sm:$0xff] }
  0x15   : > { %v2665_v40 = vld [vmem:[%s3391_s3 + $0x168] sm:$0xff]  ;;  %1091 = vmatpush.bf16.msra.mxu1 %v2651_v39  ;;  %v2650_v43 = vld [vmem:[%s3391_s3 + $0xf0] sm:$0xff]  ;;  %v2664_v44 = vld [vmem:[%s3391_s3 + $0x160] sm:$0xff] }
  0x16   : > { %1122 = vmatpush.bf16.msra.mxu2 %v2657_v16  ;;  %v2649_v47 = vld [vmem:[%s3391_s3 + $0xe8] sm:$0xff]  ;;  %v2663_v48 = vld [vmem:[%s3391_s3 + $0x158] sm:$0xff]  ;;  %v2606_v49 = vld [vmem:[%s2845_s12 + $0x50] sm:$0xff] }
  0x17   : > { %v2648_v52 = vld [vmem:[%s3391_s3 + $0xe0] sm:$0xff]  ;;  %v2662_v53 = vld [vmem:[%s3391_s3 + $0x150] sm:$0xff]  ;;  %v2647_v55 = vld [vmem:[%s3391_s3 + $0xd8] sm:$0xff] }
  0x18   : > { %537 = vmatpush.bf16.msra.mxu0 %v2616_v3  ;;  %1150 = vmatpush.bf16.msra.mxu3 %v2666_v37  ;;  %v2661_v56 = vld [vmem:[%s3391_s3 + $0x148] sm:$0xff]  ;;  %v2646_v59 = vld [vmem:[%s3391_s3 + $0xd0] sm:$0xff]  ;;  %v2660_v60 = vld [vmem:[%s3391_s3 + $0x140] sm:$0xff] }
  0x19   : > { %1092 = vmatpush.bf16.msra.mxu1 %v2650_v43  ;;  %v2645_v63 = vld [vmem:[%s3391_s3 + $0xc8] sm:$0xff]  ;;  %v2607_v0 = vld [vmem:[%s2845_s12 + $0x58] sm:$0xff]  ;;  %v2644_v3 = vld [vmem:[%s3391_s3 + $0xc0] sm:$0xff] }
  0x1a   : > { %1123 = vmatpush.bf16.msra.mxu2 %v2656_v17  ;;  %v2632_v43 = vld [vmem:[%s3391_s3 + $0x60] sm:$0xff] }
  0x1c   : > { %538 = vmatpush.bf16.msra.mxu0 %v2615_v4  ;;  %1151 = vmatpush.bf16.msra.mxu3 %v2665_v40  ;;  %v2633_v40 = vld [vmem:[%s3391_s3 + $0x68] sm:$0xff] }
  0x1d   : > { %1093 = vmatpush.bf16.msra.mxu1 %v2649_v47 }
  0x1e   : > { %1124 = vmatpush.bf16.msra.mxu2 %v2655_v18  ;;  %v2609_v18 = vld [vmem:[%s2845_s12 + $0x68] sm:$0xff] }
  0x20   : > { %539 = vmatpush.bf16.msra.mxu0 %v2614_v5  ;;  %1152 = vmatpush.bf16.msra.mxu3 %v2664_v44  ;;  %v2631_v44 = vld [vmem:[%s3391_s3 + $0x58] sm:$0xff] }
  0x21   : > { %1094 = vmatpush.bf16.msra.mxu1 %v2648_v52  ;;  %v2629_v52 = vld [vmem:[%s3391_s3 + $0x48] sm:$0xff] }
  0x22   : > { %1125 = vmatpush.bf16.msra.mxu2 %v2654_v20 }
  0x24   : > { %540 = vmatpush.bf16.msra.mxu0 %v2613_v6  ;;  %1153 = vmatpush.bf16.msra.mxu3 %v2663_v48 }
  0x25   : > { %1095 = vmatpush.bf16.msra.mxu1 %v2647_v55  ;;  %v2628_v55 = vld [vmem:[%s3391_s3 + $0x40] sm:$0xff] }
  0x26   : > { %1126 = vmatpush.bf16.msra.mxu2 %v2653_v21 }
  0x28   : > { %541 = vmatpush.bf16.msra.mxu0 %v2612_v7  ;;  %1154 = vmatpush.bf16.msra.mxu3 %v2662_v53 }
  0x29   : > { %1096 = vmatpush.bf16.msra.mxu1 %v2646_v59 }
  0x2a   : > { %1127 = vmatpush.bf16.msra.mxu2 %v2652_v22 }
  0x2b   : > { %542 = vmatmul.bf16.vlgmr.msra.gmra.mxu0 %v2596_v8 }
  0x2c   : > { %1155 = vmatpush.bf16.msra.mxu3 %v2661_v56 }
  0x2d   : > { %1097 = vmatpush.bf16.msra.mxu1 %v2645_v63  ;;  %v2627_v63 = vld [vmem:[%s3391_s3 + $0x38] sm:$0xff] }
  0x30   : > { %1156 = vmatpush.bf16.msra.mxu3 %v2660_v60 }
  0x31   : > { %1098 = vmatpush.bf16.msra.mxu1 %v2644_v3 }
  0x35   : > { %1322 = vmatpush.bf16.msrb.mxu1 %v2627_v63 }
  0x3b   : > { %547 = vmatmul.bf16.gmra.mxu0 %v2597_v9  ;;  %v2608_v9 = vld [vmem:[%s2845_s12 + $0x60] sm:$0xff] }
  0x4b   : > { %552 = vmatmul.bf16.gmra.mxu0 %v2598_v10 }
  0x5b   : > { %557 = vmatmul.bf16.gmra.mxu0 %v2599_v11 }
  0x6b   : > { %562 = vmatmul.bf16.gmra.mxu0 %v2600_v12  ;;  %v2756_v12 = vmov 0.0  }
  0x6c   : > { %692 = vst [vmem:[#allocation2 + $0xb0] sm:$0x1] %v2756_v12 }
  0x6d   : > { %693 = vst [vmem:[#allocation2 + $0xc0] sm:$0x1] %v2756_v12 }
  0x6e   : > { %694 = vst [vmem:[#allocation2 + $0xd0] sm:$0x1] %v2756_v12 }
  0x6f   : > { %695 = vst [vmem:[#allocation2 + $0xe0] sm:$0x1] %v2756_v12 }
  0x70   : > { %696 = vst [vmem:[#allocation2 + $0xf0] sm:$0x1] %v2756_v12 }
  0x71   : > { %697 = vst [vmem:[#allocation2 + $0x100] sm:$0x1] %v2756_v12 }
  0x72   : > { %698 = vst [vmem:[#allocation2 + $0x110] sm:$0x1] %v2756_v12 }
  0x73   : > { %699 = vst [vmem:[#allocation2 + $0x120] sm:$0x1] %v2756_v12 }
  0x74   : > { %717 = vst [vmem:[#allocation2 + $0x140] sm:$0xff] %v2756_v12 }
  0x75   : > { %718 = vst [vmem:[#allocation2 + $0x148] sm:$0x3] %v2756_v12 }
  0x76   : > { %748 = vst [vmem:[#allocation2 + $0x1e0] sm:$0xff] %v2756_v12 }
  0x77   : > { %749 = vst [vmem:[#allocation2 + $0x1e8] sm:$0x3] %v2756_v12 }
  0x78   : > { %754 = vst [vmem:[#allocation2 + $0x1f0] sm:$0x1] %v2756_v12 }
  0x79   : > { %755 = vst [vmem:[#allocation2 + $0x200] sm:$0x1] %v2756_v12 }
  0x7a   : > { %756 = vst [vmem:[#allocation2 + $0x210] sm:$0x1] %v2756_v12 }
  0x7b   : > { %567 = vmatmul.bf16.gmra.mxu0 %v2601_v14  ;;  %757 = vst [vmem:[#allocation2 + $0x220] sm:$0x1] %v2756_v12 }
  0x7c   : > { %758 = vst [vmem:[#allocation2 + $0x230] sm:$0x1] %v2756_v12  ;;  %v786_v59 = vld [vmem:[#allocation2 + $0x141] sm:$0xff] }
  0x7d   : > { %759 = vst [vmem:[#allocation2 + $0x240] sm:$0x1] %v2756_v12 }
  0x7e   : > { %760 = vst [vmem:[#allocation2 + $0x250] sm:$0x1] %v2756_v12  ;;  %v794_v63 = vld [vmem:[#allocation2 + $0x1e1] sm:$0xff] }
  0x7f   : > { %761 = vst [vmem:[#allocation2 + $0x260] sm:$0x1] %v2756_v12 }
  0x8b   : > { %572 = vmatmul.bf16.gmra.mxu0 %v2602_v19 }
  0x9b   : > { %577 = vmatmul.bf16.gmra.mxu0 %v2603_v23 }
  0xa8   : > { %v543_v26 = vpop.f32.mrf.mxu0 }
  0xa9   : > { %v544_v27 = vadd.f32 %v2882_v24, %v543_v26 }
  0xab   : > { %v623_v28 = vmax.f32 %v544_v27, 0.0  ;;  %582 = vmatmul.bf16.gmra.mxu0 %v2604_v25 }
  0xb0   : > { %v545_v29 = vpop.f32.mrf.mxu0 }
  0xb1   : > { %v546_v30 = vadd.f32 %v2882_v24, %v545_v29 }
  0xb3   : > { %v624_v31 = vmax.f32 %v546_v30, 0.0  ;;  %v2610_v30 = vld [vmem:[%s2845_s12 + $0x70] sm:$0xff] }
  0xb5   : > { %v887_v32 = vpack.c.bf16 %v624_v31, %v623_v28 }
  0xb7   : > { %1128 = vmatmul.bf16.vlgmr.msra.gmra.mxu2 %v887_v32  ;;  %v2635_v32 = vld [vmem:[%s3391_s3 + $0x78] sm:$0xff] }
  0xb8   : > { %v548_v35 = vpop.f32.mrf.mxu0  ;;  %1351 = vmatpush.bf16.msrb.mxu2 %v2635_v32 }
  0xb9   : > { %v549_v36 = vadd.f32 %v2882_v24, %v548_v35 }
  0xbb   : > { %v625_v38 = vmax.f32 %v549_v36, 0.0  ;;  %587 = vmatmul.bf16.gmra.mxu0 %v2605_v34  ;;  %v2634_v34 = vld [vmem:[%s3391_s3 + $0x70] sm:$0xff] }
  0xbc   : > { %1352 = vmatpush.bf16.msrb.mxu2 %v2634_v34 }
  0xc0   : > { %v550_v41 = vpop.f32.mrf.mxu0  ;;  %1353 = vmatpush.bf16.msrb.mxu2 %v2633_v40 }
  0xc1   : > { %v551_v42 = vadd.f32 %v2882_v24, %v550_v41  ;;  %v2611_v41 = vld [vmem:[%s2845_s12 + $0x78] sm:$0xff] }
  0xc3   : > { %v626_v45 = vmax.f32 %v551_v42, 0.0 }
  0xc4   : > { %1354 = vmatpush.bf16.msrb.mxu2 %v2632_v43 }
  0xc5   : > { %v890_v46 = vpack.c.bf16 %v626_v45, %v625_v38 }
  0xc7   : > { %1133 = vmatmul.bf16.gmra.mxu2 %v890_v46  ;;  %v2630_v46 = vld [vmem:[%s3391_s3 + $0x50] sm:$0xff] }
  0xc8   : > { %v553_v50 = vpop.f32.mrf.mxu0  ;;  %1355 = vmatpush.bf16.msrb.mxu2 %v2631_v44  ;;  %v2677_v44 = vld [vmem:[%s3391_s3 + $0x1c8] sm:$0xff] }
  0xc9   : > { %v554_v51 = vadd.f32 %v2882_v24, %v553_v50 }
  0xcb   : > { %v627_v54 = vmax.f32 %v554_v51, 0.0  ;;  %592 = vmatmul.bf16.gmra.mxu0 %v2606_v49 }
  0xcc   : > { %1356 = vmatpush.bf16.msrb.mxu2 %v2630_v46  ;;  %v2691_v46 = vld [vmem:[%s3391_s3 + $0x238] sm:$0xff] }
  0xd0   : > { %v555_v57 = vpop.f32.mrf.mxu0  ;;  %1357 = vmatpush.bf16.msrb.mxu2 %v2629_v52  ;;  %v2675_v52 = vld [vmem:[%s3391_s3 + $0x1b8] sm:$0xff] }
  0xd1   : > { %v556_v58 = vadd.f32 %v2882_v24, %v555_v57 }
  0xd3   : > { %v628_v61 = vmax.f32 %v556_v58, 0.0 }
  0xd4   : > { %1358 = vmatpush.bf16.msrb.mxu2 %v2628_v55 }
  0xd5   : > { %v893_v62 = vpack.c.bf16 %v628_v61, %v627_v54 }
  0xd7   : > { %1138 = vmatmul.bf16.gmra.mxu2 %v893_v62  ;;  %v2643_v62 = vld [vmem:[%s3391_s3 + $0xb8] sm:$0xff] }
  0xd8   : > { %v558_v1 = vpop.f32.mrf.mxu0  ;;  %1380 = vmatpush.bf16.msrb.mxu3 %v2643_v62 }
  0xd9   : > { %v559_v2 = vadd.f32 %v2882_v24, %v558_v1  ;;  %v2642_v1 = vld [vmem:[%s3391_s3 + $0xb0] sm:$0xff] }
  0xdb   : > { %v629_v4 = vmax.f32 %v559_v2, 0.0  ;;  %597 = vmatmul.bf16.gmra.mxu0 %v2607_v0  ;;  %v2626_v2 = vld [vmem:[%s3391_s3 + $0x30] sm:$0xff] }
  0xdc   : > { %1381 = vmatpush.bf16.msrb.mxu3 %v2642_v1  ;;  %1323 = vmatpush.bf16.msrb.mxu1 %v2626_v2 }
  0xe0   : > { %v560_v5 = vpop.f32.mrf.mxu0 }
  0xe1   : > { %v561_v6 = vadd.f32 %v2882_v24, %v560_v5  ;;  %v2641_v5 = vld [vmem:[%s3391_s3 + $0xa8] sm:$0xff] }
  0xe2   : > { %1382 = vmatpush.bf16.msrb.mxu3 %v2641_v5  ;;  %v2673_v5 = vld [vmem:[%s3391_s3 + $0x1a8] sm:$0xff] }
  0xe3   : > { %v630_v7 = vmax.f32 %v561_v6, 0.0  ;;  %v2625_v6 = vld [vmem:[%s3391_s3 + $0x28] sm:$0xff] }
  0xe4   : > { %1324 = vmatpush.bf16.msrb.mxu1 %v2625_v6 }
  0xe5   : > { %v896_v8 = vpack.c.bf16 %v630_v7, %v629_v4 }
  0xe7   : > { %1143 = vmatmul.bf16.gmra.mxu2 %v896_v8 }
  0xe8   : > { %v563_v10 = vpop.f32.mrf.mxu0 }
  0xe9   : > { %v564_v11 = vadd.f32 %v2882_v24, %v563_v10  ;;  %v2624_v10 = vld [vmem:[%s3391_s3 + $0x20] sm:$0xff] }
  0xea   : > { %1325 = vmatpush.bf16.msrb.mxu1 %v2624_v10 }
  0xeb   : > { %v631_v13 = vmax.f32 %v564_v11, 0.0  ;;  %602 = vmatmul.bf16.gmra.mxu0 %v2608_v9  ;;  %v2640_v9 = vld [vmem:[%s3391_s3 + $0xa0] sm:$0xff] }
  0xec   : > { %1383 = vmatpush.bf16.msrb.mxu3 %v2640_v9 }
  0xed   : > { %708 = vst [vmem:[#allocation2 + $0xb1] sm:$0xff] %v631_v13 }
  0xf0   : > { %v565_v14 = vpop.f32.mrf.mxu0 }
  0xf1   : > { %v566_v15 = vadd.f32 %v2882_v24, %v565_v14 }
  0xf3   : > { %v632_v16 = vmax.f32 %v566_v15, 0.0 }
  0xf4   : > { %v862_v22 = vld [vmem:[#allocation2 + $0xb0] sm:$0xff] }
  0xf5   : > { %709 = vst [vmem:[#allocation2 + $0xc1] sm:$0xff] %v632_v16  ;;  %v888_v17 = vpack.c.bf16 %v632_v16, %v631_v13  ;;  %v2639_v16 = vld [vmem:[%s3391_s3 + $0x98] sm:$0xff] }
  0xf6   : > { %1384 = vmatpush.bf16.msrb.mxu3 %v2639_v16 }
  0xf7   : > { %1157 = vmatmul.bf16.vlgmr.msra.gmra.mxu3 %v888_v17 }
  0xf8   : > { %v568_v19 = vpop.f32.mrf.mxu0 }
  0xf9   : > { %v569_v20 = vadd.f32 %v2882_v24, %v568_v19  ;;  %v2623_v19 = vld [vmem:[%s3391_s3 + $0x18] sm:$0xff] }
  0xfa   : > { %1326 = vmatpush.bf16.msrb.mxu1 %v2623_v19 }
  0xfb   : > { %v633_v21 = vmax.f32 %v569_v20, 0.0  ;;  %607 = vmatmul.bf16.gmra.mxu0 %v2609_v18  ;;  %v2683_v18 = vld [vmem:[%s3391_s3 + $0x1f8] sm:$0xff] }
  0xfc   : > { %v863_v23 = vld [vmem:[#allocation2 + $0xc0] sm:$0xff]  ;;  %1667 = vmatpush.bf16.msra.mxu2 %v2683_v18 }
  0xfd   : > { %710 = vst [vmem:[#allocation2 + $0xd1] sm:$0xff] %v633_v21  ;;  %v886_v25 = vpack.c.bf16 %v863_v23, %v862_v22  ;;  %v2638_v22 = vld [vmem:[%s3391_s3 + $0x90] sm:$0xff] }
  0xfe   : > { %1385 = vmatpush.bf16.msrb.mxu3 %v2638_v22 }
  0xff   : > { %1099 = vmatmul.bf16.vlgmr.msra.gmra.mxu1 %v886_v25 }
 0x100   : > { %v570_v26 = vpop.f32.mrf.mxu0 }
 0x101   : > { %v571_v27 = vadd.f32 %v2882_v24, %v570_v26  ;;  %v2681_v26 = vld [vmem:[%s3391_s3 + $0x1e8] sm:$0xff] }
 0x103   : > { %v634_v28 = vmax.f32 %v571_v27, 0.0  ;;  %v2622_v27 = vld [vmem:[%s3391_s3 + $0x10] sm:$0xff] }
 0x104   : > { %v864_v56 = vld [vmem:[#allocation2 + $0xd0] sm:$0xff]  ;;  %1327 = vmatpush.bf16.msrb.mxu1 %v2622_v27  ;;  %v2688_v27 = vld [vmem:[%s3391_s3 + $0x220] sm:$0xff] }
 0x105   : > { %v891_v29 = vpack.c.bf16 %v634_v28, %v633_v21  ;;  %711 = vst [vmem:[#allocation2 + $0xe1] sm:$0xff] %v634_v28  ;;  %v2682_v21 = vld [vmem:[%s3391_s3 + $0x1f0] sm:$0xff]  ;;  %v2637_v28 = vld [vmem:[%s3391_s3 + $0x88] sm:$0xff] }
 0x106   : > { %1668 = vmatpush.bf16.msra.mxu2 %v2682_v21  ;;  %1386 = vmatpush.bf16.msrb.mxu3 %v2637_v28 }
 0x107   : > { %1162 = vmatmul.bf16.gmra.mxu3 %v891_v29 }
 0x108   : > { %v573_v31 = vpop.f32.mrf.mxu0 }
 0x109   : > { %v574_v33 = vadd.f32 %v2882_v24, %v573_v31  ;;  %v2680_v31 = vld [vmem:[%s3391_s3 + $0x1e0] sm:$0xff] }
 0x10a   : > { %1669 = vmatpush.bf16.msra.mxu2 %v2681_v26 }
 0x10b   : > { %612 = vmatmul.bf16.gmra.mxu0 %v2610_v30  ;;  %v635_v37 = vmax.f32 %v574_v33, 0.0 }
 0x10c   : > { %v865_v57 = vld [vmem:[#allocation2 + $0xe0] sm:$0xff] }
 0x10d   : > { %712 = vst [vmem:[#allocation2 + $0xf1] sm:$0xff] %v635_v37  ;;  %v889_v60 = vpack.c.bf16 %v865_v57, %v864_v56 }
 0x10e   : > { %1670 = vmatpush.bf16.msra.mxu2 %v2680_v31 }
 0x10f   : > { %1104 = vmatmul.bf16.gmra.mxu1 %v889_v60  ;;  %v2689_v60 = vld [vmem:[%s3391_s3 + $0x228] sm:$0xff] }
 0x110   : > { %v575_v35 = vpop.f32.mrf.mxu0 }
 0x111   : > { %v576_v36 = vadd.f32 %v2882_v24, %v575_v35 }
 0x113   : > { %v636_v38 = vmax.f32 %v576_v36, 0.0 }
 0x114   : > { %v866_v11 = vld [vmem:[#allocation2 + $0xf0] sm:$0xff] }
 0x115   : > { %v894_v39 = vpack.c.bf16 %v636_v38, %v635_v37  ;;  %713 = vst [vmem:[#allocation2 + $0x101] sm:$0xff] %v636_v38  ;;  %v2679_v37 = vld [vmem:[%s3391_s3 + $0x1d8] sm:$0xff]  ;;  %v2621_v38 = vld [vmem:[%s3391_s3 + $0x8] sm:$0xff] }
 0x116   : > { %1328 = vmatpush.bf16.msrb.mxu1 %v2621_v38  ;;  %1671 = vmatpush.bf16.msra.mxu2 %v2679_v37 }
 0x117   : > { %1167 = vmatmul.bf16.gmra.mxu3 %v894_v39  ;;  %v2636_v39 = vld [vmem:[%s3391_s3 + $0x80] sm:$0xff] }
 0x118   : > { %v578_v42 = vpop.f32.mrf.mxu0  ;;  %1387 = vmatpush.bf16.msrb.mxu3 %v2636_v39  ;;  %v2671_v39 = vld [vmem:[%s3391_s3 + $0x198] sm:$0xff] }
 0x119   : > { %v579_v45 = vadd.f32 %v2882_v24, %v578_v42 }
 0x11b   : > { %617 = vmatmul.bf16.gmra.mxu0 %v2611_v41  ;;  %v637_v49 = vmax.f32 %v579_v45, 0.0  ;;  %v2678_v41 = vld [vmem:[%s3391_s3 + $0x1d0] sm:$0xff]  ;;  %v2620_v45 = vld [vmem:[%s3391_s3] sm:$0xff] }
 0x11c   : > { %v867_v7 = vld [vmem:[#allocation2 + $0x100] sm:$0xff]  ;;  %1672 = vmatpush.bf16.msra.mxu2 %v2678_v41  ;;  %1329 = vmatpush.bf16.msrb.mxu1 %v2620_v45  ;;  %v2686_v45 = vld [vmem:[%s3391_s3 + $0x210] sm:$0xff] }
 0x11d   : > { %714 = vst [vmem:[#allocation2 + $0x111] sm:$0xff] %v637_v49  ;;  %v892_v14 = vpack.c.bf16 %v867_v7, %v866_v11  ;;  %1696 = vmatpush.bf16.msra.mxu3 %v2691_v46 }
 0x11f   : > { %1109 = vmatmul.bf16.gmra.mxu1 %v892_v14 }
 0x120   : > { %v580_v47 = vpop.f32.mrf.mxu0  ;;  %1673 = vmatpush.bf16.msra.mxu2 %v2677_v44  ;;  %1638 = vmatpush.bf16.msra.mxu1 %v2675_v52 }
 0x121   : > { %v581_v48 = vadd.f32 %v2882_v24, %v580_v47 }
 0x123   : > { %v638_v50 = vmax.f32 %v581_v48, 0.0  ;;  %v2676_v48 = vld [vmem:[%s3391_s3 + $0x1c0] sm:$0xff] }
 0x124   : > { %v868_v32 = vld [vmem:[#allocation2 + $0x110] sm:$0xff]  ;;  %1674 = vmatpush.bf16.msra.mxu2 %v2676_v48 }
 0x125   : > { %v897_v51 = vpack.c.bf16 %v638_v50, %v637_v49  ;;  %715 = vst [vmem:[#allocation2 + $0x121] sm:$0xff] %v638_v50  ;;  %v2670_v48 = vld [vmem:[%s3391_s3 + $0x190] sm:$0xff] }
 0x127   : > { %1172 = vmatmul.bf16.gmra.mxu3 %v897_v51 }
 0x128   : > { %v583_v53 = vpop.f32.mrf.mxu0 }
 0x129   : > { %v2998_v54 = vadd.f32 %v2882_v24, %v583_v53  ;;  %v2690_v53 = vld [vmem:[%s3391_s3 + $0x230] sm:$0xff] }
 0x12a   : > { %1697 = vmatpush.bf16.msra.mxu3 %v2690_v53 }
 0x12b   : > { %v639_v58 = vmax.f32 %v2998_v54, 0.0 }
 0x12c   : > { %v869_v29 = vld [vmem:[#allocation2 + $0x120] sm:$0xff] }
 0x12d   : > { %v803_v61 = vpack.c.bf16 %v639_v58, %v786_v59  ;;  %v895_v34 = vpack.c.bf16 %v869_v29, %v868_v32  ;;  %v2674_v59 = vld [vmem:[%s3391_s3 + $0x1b0] sm:$0xff] }
 0x12e   : > { %1639 = vmatpush.bf16.msra.mxu1 %v2674_v59  ;;  %1698 = vmatpush.bf16.msra.mxu3 %v2689_v60 }
 0x12f   : > { %1359 = vmatmul.bf16.vlgmr.msrb.gmra.mxu2 %v803_v61  ;;  %1114 = vmatmul.bf16.gmra.mxu1 %v895_v34 }
 0x130   : > { %v585_v0 = vpop.f32.mrf.mxu0 }
 0x131   : > { %v3019_v3 = vadd.f32 %v2882_v24, %v585_v0 }
 0x132   : > { %1640 = vmatpush.bf16.msra.mxu1 %v2673_v5  ;;  %1699 = vmatpush.bf16.msra.mxu3 %v2688_v27  ;;  %v2668_v5 = vld [vmem:[%s3391_s3 + $0x180] sm:$0xff] }
 0x133   : > { %v640_v4 = vmax.f32 %v3019_v3, 0.0 }
 0x135   : > { %v1434_v2 = vpack.c.bf16 %v640_v4, %v639_v58 }
 0x138   : > { %v588_v8 = vpop.f32.mrf.mxu0 }
 0x139   : > { %v3035_v13 = vadd.f32 %v2882_v24, %v588_v8 }
 0x13a   : > { %v1129_v10 = vpop.f32.mrf.mxu2 }
 0x13b   : > { %v641_v15 = vmax.f32 %v3035_v13, 0.0 }
 0x13d   : > { %v806_v17 = vpack.c.bf16 %v641_v15, %v640_v4 }
 0x13f   : > { %1364 = vmatmul.bf16.gmra.mxu2 %v806_v17 }
 0x140   : > { %v590_v20 = vpop.f32.mrf.mxu0 }
 0x141   : > { %v3058_v23 = vadd.f32 %v2882_v24, %v590_v20 }
 0x142   : > { %v3192_v34 = vpop.f32.mrf.mxu2 }
 0x143   : > { %v642_v25 = vmax.f32 %v3058_v23, 0.0 }
 0x145   : > { %v1437_v17 = vpack.c.bf16 %v642_v25, %v641_v15 }
 0x148   : > { %v593_v30 = vpop.f32.mrf.mxu0 }
 0x149   : > { %v3074_v33 = vadd.f32 %v2882_v24, %v593_v30  ;;  %v2672_v30 = vld [vmem:[%s3391_s3 + $0x1a0] sm:$0xff] }
 0x14a   : > { %1641 = vmatpush.bf16.msra.mxu1 %v2672_v30  ;;  %v1134_v44 = vpop.f32.mrf.mxu2  ;;  %v2707_v30 = vld [vmem:[%s3395_s7 + $0x38] sm:$0xff] }
 0x14b   : > { %v643_v35 = vmax.f32 %v3074_v33, 0.0  ;;  %1922 = vmatpush.bf16.msrb.mxu2 %v2707_v30 }
 0x14d   : > { %v809_v36 = vpack.c.bf16 %v643_v35, %v642_v25 }
 0x14e   : > { %1642 = vmatpush.bf16.msra.mxu1 %v2671_v39 }
 0x14f   : > { %1369 = vmatmul.bf16.gmra.mxu2 %v809_v36 }
 0x150   : > { %v595_v40 = vpop.f32.mrf.mxu0 }
 0x151   : > { %v3094_v42 = vadd.f32 %v2882_v24, %v595_v40 }
 0x152   : > { %1643 = vmatpush.bf16.msra.mxu1 %v2670_v48 }
 0x153   : > { %v644_v43 = vmax.f32 %v3094_v42, 0.0 }
 0x155   : > { %v1440_v29 = vpack.c.bf16 %v644_v43, %v643_v35  ;;  %v2687_v35 = vld [vmem:[%s3391_s3 + $0x218] sm:$0xff] }
 0x156   : > { %1700 = vmatpush.bf16.msra.mxu3 %v2687_v35 }
 0x158   : > { %v598_v47 = vpop.f32.mrf.mxu0 }
 0x159   : > { %v3110_v49 = vadd.f32 %v2882_v24, %v598_v47 }
 0x15a   : > { %1701 = vmatpush.bf16.msra.mxu3 %v2686_v45 }
 0x15b   : > { %v645_v50 = vmax.f32 %v3110_v49, 0.0  ;;  %v2685_v49 = vld [vmem:[%s3391_s3 + $0x208] sm:$0xff] }
 0x15d   : > { %v812_v51 = vpack.c.bf16 %v645_v50, %v644_v43 }
 0x15e   : > { %1702 = vmatpush.bf16.msra.mxu3 %v2685_v49  ;;  %v2696_v49 = vld [vmem:[%s3393_s5 + $0x20] sm:$0xff] }
 0x15f   : > { %1374 = vmatmul.bf16.gmra.mxu2 %v812_v51 }
 0x160   : > { %v600_v55 = vpop.f32.mrf.mxu0 }
 0x161   : > { %v3124_v56 = vadd.f32 %v2882_v24, %v600_v55 }
 0x163   : > { %v646_v57 = vmax.f32 %v3124_v56, 0.0 }
 0x165   : > { %v1443_v47 = vpack.c.bf16 %v646_v57, %v645_v50  ;;  %v3229_v57 = vpop.f32.mrf.mxu2 }
 0x168   : > { %v603_v61 = vpop.f32.mrf.mxu0 }
 0x169   : > { %v604_v62 = vadd.f32 %v2882_v24, %v603_v61  ;;  %v2669_v61 = vld [vmem:[%s3391_s3 + $0x188] sm:$0xff] }
 0x16a   : > { %1644 = vmatpush.bf16.msra.mxu1 %v2669_v61 }
 0x16b   : > { %v3134_v0 = vmax.f32 %v604_v62, 0.0 }
 0x16d   : > { %770 = vst [vmem:[#allocation2 + $0x1f1] sm:$0xff] %v3134_v0  ;;  %v804_v1 = vpack.c.bf16 %v3134_v0, %v794_v63 }
 0x16e   : > { %1645 = vmatpush.bf16.msra.mxu1 %v2668_v5 }
 0x16f   : > { %1388 = vmatmul.bf16.vlgmr.msrb.gmra.mxu3 %v804_v1  ;;  %1675 = vmatmul.bf16.vlgmr.msra.gmra.mxu2 %v1434_v2 }
 0x170   : > { %v605_v6 = vpop.f32.mrf.mxu0 }
 0x171   : > { %v606_v7 = vadd.f32 %v2882_v24, %v605_v6 }
 0x173   : > { %v3146_v8 = vmax.f32 %v606_v7, 0.0  ;;  %v1139_v7 = vpop.f32.mrf.mxu2 }
 0x174   : > { %v3148_v9 = vld [vmem:[#allocation2 + $0x1f0] sm:$0xff] }
 0x175   : > { %771 = vst [vmem:[#allocation2 + $0x201] sm:$0xff] %v3146_v8  ;;  %v802_v54 = vpack.c.bf16 %v3148_v9, %v2756_v12  ;;  %v1435_v1 = vpack.c.bf16 %v3146_v8, %v3134_v0 }
 0x177   : > { %1330 = vmatmul.bf16.vlgmr.msrb.gmra.mxu1 %v802_v54 }
 0x178   : > { %v608_v58 = vpop.f32.mrf.mxu0 }
 0x179   : > { %v609_v3 = vadd.f32 %v2882_v24, %v608_v58 }
 0x17a   : > { %v1158_v12 = vpop.f32.mrf.mxu3 }
 0x17b   : > { %v3154_v4 = vmax.f32 %v609_v3, 0.0 }
 0x17c   : > { %v1100_v11 = vpop.f32.mrf.mxu1  ;;  %v3168_v22 = vld [vmem:[#allocation2 + $0x200] sm:$0xff] }
 0x17d   : > { %772 = vst [vmem:[#allocation2 + $0x211] sm:$0xff] %v3154_v4  ;;  %v1130_v14 = vadd.f32 %v1129_v10, %v1100_v11  ;;  %v807_v16 = vpack.c.bf16 %v3154_v4, %v3146_v8  ;;  %v1433_v58 = vpack.c.bf16 %v3168_v22, %v3148_v9  ;;  %v3250_v10 = vpop.f32.mrf.mxu2 }
 0x17f   : > { %v3163_v18 = vadd.f32 %v1158_v12, %v1130_v14  ;;  %1393 = vmatmul.bf16.gmra.mxu3 %v807_v16  ;;  %1680 = vmatmul.bf16.gmra.mxu2 %v1437_v17 }
 0x180   : > { %v610_v19 = vpop.f32.mrf.mxu0 }
 0x181   : > { %v611_v20 = vadd.f32 %v2882_v24, %v610_v19 }
 0x182   : > { %v3210_v42 = vpop.f32.mrf.mxu3 }
 0x183   : > { %v3166_v21 = vmax.f32 %v611_v20, 0.0 }
 0x184   : > { %v3170_v26 = vld [vmem:[#allocation2 + $0x210] sm:$0xff]  ;;  %v3223_v52 = vpop.f32.mrf.mxu1 }
 0x185   : > { %773 = vst [vmem:[#allocation2 + $0x221] sm:$0xff] %v3166_v21  ;;  %v805_v13 = vpack.c.bf16 %v3170_v26, %v3168_v22  ;;  %v1438_v11 = vpack.c.bf16 %v3166_v21, %v3154_v4  ;;  %v1144_v12 = vpop.f32.mrf.mxu2 }
 0x187   : > { %1335 = vmatmul.bf16.gmra.mxu1 %v805_v13 }
 0x188   : > { %v613_v15 = vpop.f32.mrf.mxu0 }
 0x189   : > { %v614_v23 = vadd.f32 %v2882_v24, %v613_v15 }
 0x18a   : > { %v1163_v50 = vpop.f32.mrf.mxu3 }
 0x18b   : > { %v3176_v25 = vmax.f32 %v614_v23, 0.0 }
 0x18c   : > { %v3196_v37 = vld [vmem:[#allocation2 + $0x220] sm:$0xff]  ;;  %v1105_v62 = vpop.f32.mrf.mxu1 }
 0x18d   : > { %774 = vst [vmem:[#allocation2 + $0x231] sm:$0xff] %v3176_v25  ;;  %v810_v28 = vpack.c.bf16 %v3176_v25, %v3166_v21  ;;  %v1135_v63 = vadd.f32 %v1134_v44, %v1105_v62  ;;  %v1436_v9 = vpack.c.bf16 %v3196_v37, %v3170_v26  ;;  %v3264_v15 = vpop.f32.mrf.mxu2 }
 0x18f   : > { %1398 = vmatmul.bf16.gmra.mxu3 %v810_v28  ;;  %1685 = vmatmul.bf16.gmra.mxu2 %v1440_v29  ;;  %v3239_v2 = vadd.f32 %v1163_v50, %v1135_v63  ;;  %v2703_v50 = vld [vmem:[%s3395_s7 + $0x18] sm:$0xff] }
 0x190   : > { %v615_v31 = vpop.f32.mrf.mxu0 }
 0x191   : > { %v616_v32 = vadd.f32 %v2882_v24, %v615_v31 }
 0x192   : > { %v3244_v6 = vpop.f32.mrf.mxu3 }
 0x193   : > { %v3194_v36 = vmax.f32 %v616_v32, 0.0 }
 0x194   : > { %v3198_v33 = vld [vmem:[#allocation2 + $0x230] sm:$0xff]  ;;  %v3246_v54 = vpop.f32.mrf.mxu1 }
 0x195   : > { %775 = vst [vmem:[#allocation2 + $0x241] sm:$0xff] %v3194_v36  ;;  %v808_v38 = vpack.c.bf16 %v3198_v33, %v3196_v37  ;;  %v1441_v13 = vpack.c.bf16 %v3194_v36, %v3176_v25  ;;  %v2706_v37 = vld [vmem:[%s3395_s7 + $0x30] sm:$0xff] }
 0x196   : > { %1923 = vmatpush.bf16.msrb.mxu2 %v2706_v37 }
 0x197   : > { %1340 = vmatmul.bf16.gmra.mxu1 %v808_v38 }
 0x198   : > { %v618_v40 = vpop.f32.mrf.mxu0 }
 0x199   : > { %v619_v41 = vadd.f32 %v2882_v24, %v618_v40  ;;  %v2698_v40 = vld [vmem:[%s3393_s5 + $0x30] sm:$0xff] }
 0x19a   : > { %v1168_v3 = vpop.f32.mrf.mxu3 }
 0x19b   : > { %v653_v43 = vmax.f32 %v619_v41, 0.0  ;;  %v2705_v41 = vld [vmem:[%s3395_s7 + $0x28] sm:$0xff] }
 0x19c   : > { %v784_v59 = vld [vmem:[#allocation2 + $0x240] sm:$0xff]  ;;  %v1110_v0 = vpop.f32.mrf.mxu1  ;;  %1924 = vmatpush.bf16.msrb.mxu2 %v2705_v41 }
 0x19d   : > { %776 = vst [vmem:[#allocation2 + $0x251] sm:$0xff] %v653_v43  ;;  %v813_v46 = vpack.c.bf16 %v653_v43, %v3194_v36  ;;  %v1140_v8 = vadd.f32 %v1139_v7, %v1110_v0  ;;  %v1439_v21 = vpack.c.bf16 %v784_v59, %v3198_v33  ;;  %v2699_v36 = vld [vmem:[%s3393_s5 + $0x38] sm:$0xff] }
 0x19e   : > { %1825 = vmatpush.bf16.msrb.mxu1 %v2699_v36  ;;  %v2695_v7 = vld [vmem:[%s3393_s5 + $0x18] sm:$0xff] }
 0x19f   : > { %1403 = vmatmul.bf16.gmra.mxu3 %v813_v46  ;;  %1690 = vmatmul.bf16.gmra.mxu2 %v1443_v47  ;;  %v3254_v14 = vadd.f32 %v1168_v3, %v1140_v8 }
 0x1a0   : > { %v620_v51 = vpop.f32.mrf.mxu0 }
 0x1a1   : > { %v621_v53 = vadd.f32 %v2882_v24, %v620_v51  ;;  %v2684_v24 = vld [vmem:[%s3391_s3 + $0x200] sm:$0xff]  ;;  %v2697_v51 = vld [vmem:[%s3393_s5 + $0x28] sm:$0xff] }
 0x1a2   : > { %1703 = vmatpush.bf16.msra.mxu3 %v2684_v24  ;;  %v3258_v17 = vpop.f32.mrf.mxu3  ;;  %1826 = vmatpush.bf16.msrb.mxu1 %v2698_v40 }
 0x1a3   : > { %v654_v55 = vmax.f32 %v621_v53, 0.0  ;;  %v2704_v53 = vld [vmem:[%s3395_s7 + $0x20] sm:$0xff] }
 0x1a4   : > { %v785_v60 = vld [vmem:[#allocation2 + $0x250] sm:$0xff]  ;;  %v3256_v16 = vpop.f32.mrf.mxu1  ;;  %1925 = vmatpush.bf16.msrb.mxu2 %v2704_v53 }
 0x1a5   : > { %777 = vst [vmem:[#allocation2 + $0x261] sm:$0xff] %v654_v55  ;;  %v811_v56 = vpack.c.bf16 %v785_v60, %v784_v59  ;;  %v1444_v27 = vpack.c.bf16 %v654_v55, %v653_v43  ;;  %v1132_v43 = vadd.f32 %v3192_v34, %v3223_v52 }
 0x1a6   : > { %1827 = vmatpush.bf16.msrb.mxu1 %v2697_v51 }
 0x1a7   : > { %1345 = vmatmul.bf16.gmra.mxu1 %v811_v56  ;;  %v1161_v47 = vadd.f32 %v3210_v42, %v1132_v43  ;;  %v1137_v56 = vadd.f32 %v3229_v57, %v3246_v54 }
 0x1a8   : > { %1926 = vmatpush.bf16.msrb.mxu2 %v2703_v50  ;;  %v2746_v50 = vld [vmem:[%s2845_s12 + $0x10] sm:$0xff] }
 0x1aa   : > { %v1173_v22 = vpop.f32.mrf.mxu3  ;;  %1828 = vmatpush.bf16.msrb.mxu1 %v2696_v49 }
 0x1ac   : > { %v1115_v19 = vpop.f32.mrf.mxu1  ;;  %v1416_v26 = vld [vmem:[#allocation2 + $0x260] sm:$0xff] }
 0x1ad   : > { %v1145_v20 = vadd.f32 %v1144_v12, %v1115_v19  ;;  %v1442_v29 = vpack.c.bf16 %v1416_v26, %v785_v60  ;;  %v2701_v12 = vld [vmem:[%s3395_s7 + $0x8] sm:$0xff] }
 0x1ae   : > { %1829 = vmatpush.bf16.msrb.mxu1 %v2695_v7 }
 0x1af   : > { %1704 = vmatmul.bf16.vlgmr.msra.gmra.mxu3 %v1435_v1  ;;  %v3266_v4 = vadd.f32 %v1173_v22, %v1145_v20  ;;  %v1166_v1 = vadd.f32 %v3244_v6, %v1137_v56 }
 0x1b2   : > { %v1360_v23 = vpop.f32.mrf.mxu2  ;;  %v3272_v25 = vpop.f32.mrf.mxu3 }
 0x1b4   : > { %v3274_v32 = vpop.f32.mrf.mxu1 }
 0x1b5   : > { %v1147_v36 = vadd.f32 %v3264_v15, %v3274_v32  ;;  %v2745_v15 = vld [vmem:[%s2845_s12 + $0x8] sm:$0xff] }
 0x1b7   : > { %1646 = vmatmul.bf16.vlgmr.msra.gmra.mxu1 %v1433_v58  ;;  %v2702_v58 = vld [vmem:[%s3395_s7 + $0x10] sm:$0xff] }
 0x1b8   : > { %1927 = vmatpush.bf16.msrb.mxu2 %v2702_v58 }
 0x1ba   : > { %v1362_v28 = vpop.f32.mrf.mxu2 }
 0x1bc   : > { %1928 = vmatpush.bf16.msrb.mxu2 %v2701_v12  ;;  %v2747_v12 = vld [vmem:[%s2845_s12 + $0x18] sm:$0xff] }
 0x1bf   : > { %1709 = vmatmul.bf16.gmra.mxu3 %v1438_v11  ;;  %v2694_v11 = vld [vmem:[%s3393_s5 + $0x10] sm:$0xff] }
 0x1c0   : > { %1830 = vmatpush.bf16.msrb.mxu1 %v2694_v11 }
 0x1c2   : > { %v1365_v31 = vpop.f32.mrf.mxu2 }
 0x1c7   : > { %1651 = vmatmul.bf16.gmra.mxu1 %v1436_v9  ;;  %v1142_v9 = vadd.f32 %v3250_v10, %v3256_v16  ;;  %v2693_v10 = vld [vmem:[%s3393_s5 + $0x8] sm:$0xff] }
 0x1c8   : > { %1831 = vmatpush.bf16.msrb.mxu1 %v2693_v10 }
 0x1ca   : > { %v1367_v35 = vpop.f32.mrf.mxu2 }
 0x1cf   : > { %1714 = vmatmul.bf16.gmra.mxu3 %v1441_v13 }
 0x1d2   : > { %v1370_v55 = vpop.f32.mrf.mxu2 }
 0x1d7   : > { %1656 = vmatmul.bf16.gmra.mxu1 %v1439_v21 }
 0x1da   : > { %v1372_v24 = vpop.f32.mrf.mxu2 }
 0x1df   : > { %1719 = vmatmul.bf16.gmra.mxu3 %v1444_v27  ;;  %v2700_v27 = vld [vmem:[%s3395_s7] sm:$0xff] }
 0x1e0   : > { %1929 = vmatpush.bf16.msrb.mxu2 %v2700_v27 }
 0x1e2   : > { %v1375_v3 = vpop.f32.mrf.mxu2 }
 0x1e7   : > { %1661 = vmatmul.bf16.gmra.mxu1 %v1442_v29  ;;  %v2744_v29 = vld [vmem:[%s2845_s12] sm:$0xff] }
 0x1e8   : > { %1930 = vmatmul.bf16.vlgmr.msrb.gmra.mxu2 %v2744_v29 }
 0x1ea   : > { %v1377_v13 = vpop.f32.mrf.mxu2 }
 0x1f2   : > { %v1389_v33 = vpop.f32.mrf.mxu3 }
 0x1f4   : > { %v1331_v38 = vpop.f32.mrf.mxu1 }
 0x1f5   : > { %v1332_v39 = vadd.f32 %v1331_v38, %v3163_v18 }
 0x1f7   : > { %v1361_v44 = vadd.f32 %v1360_v23, %v1332_v39  ;;  %v1176_v39 = vadd.f32 %v3272_v25, %v1147_v36  ;;  %v2741_v25 = vld [vmem:[%s3392_s4] ss:$0 sm:$0xff] }
 0x1f8   : > { %1935 = vmatmul.bf16.gmra.mxu2 %v2745_v15 }
 0x1f9   : > { %v3291_v45 = vadd.f32 %v1389_v33, %v1361_v44  ;;  %v2692_v33 = vld [vmem:[%s3393_s5] sm:$0xff] }
 0x1fa   : > { %v1391_v46 = vpop.f32.mrf.mxu3  ;;  %1832 = vmatpush.bf16.msrb.mxu1 %v2692_v33 }
 0x1fc   : > { %v1333_v18 = vpop.f32.mrf.mxu1 }
 0x1fd   : > { %v1334_v48 = vadd.f32 %v1333_v18, %v1161_v47 }
 0x1ff   : > { %v1363_v34 = vadd.f32 %v1362_v28, %v1334_v48 }
 0x201   : > { %v3300_v52 = vadd.f32 %v1391_v46, %v1363_v34 }
 0x202   : > { %v1394_v59 = vpop.f32.mrf.mxu3 }
 0x204   : > { %v1336_v60 = vpop.f32.mrf.mxu1 }
 0x205   : > { %v1337_v42 = vadd.f32 %v1336_v60, %v3239_v2 }
 0x207   : > { %v1366_v61 = vadd.f32 %v1365_v31, %v1337_v42  ;;  %v1676_v31 = vpop.f32.mrf.mxu2 }
 0x208   : > { %1940 = vmatmul.bf16.gmra.mxu2 %v2746_v50 }
 0x209   : > { %v3311_v62 = vadd.f32 %v1394_v59, %v1366_v61 }
 0x20a   : > { %v1396_v63 = vpop.f32.mrf.mxu3 }
 0x20c   : > { %v1338_v2 = vpop.f32.mrf.mxu1 }
 0x20d   : > { %v1339_v5 = vadd.f32 %v1338_v2, %v1166_v1 }
 0x20f   : > { %v1368_v57 = vadd.f32 %v1367_v35, %v1339_v5  ;;  %v1678_v44 = vpop.f32.mrf.mxu2 }
 0x211   : > { %v3320_v54 = vadd.f32 %v1396_v63, %v1368_v57 }
 0x212   : > { %v1399_v0 = vpop.f32.mrf.mxu3 }
 0x214   : > { %v1341_v8 = vpop.f32.mrf.mxu1 }
 0x215   : > { %v1342_v6 = vadd.f32 %v1341_v8, %v3254_v14  ;;  %v1171_v14 = vadd.f32 %v3258_v17, %v1142_v9 }
 0x217   : > { %v1371_v19 = vadd.f32 %v1370_v55, %v1342_v6  ;;  %v1681_v48 = vpop.f32.mrf.mxu2 }
 0x218   : > { %1945 = vmatmul.bf16.gmra.mxu2 %v2747_v12 }
 0x219   : > { %v3331_v20 = vadd.f32 %v1399_v0, %v1371_v19 }
 0x21a   : > { %v1401_v22 = vpop.f32.mrf.mxu3 }
 0x21c   : > { %v1343_v21 = vpop.f32.mrf.mxu1 }
 0x21d   : > { %v1344_v23 = vadd.f32 %v1343_v21, %v1171_v14 }
 0x21f   : > { %v1373_v16 = vadd.f32 %v1372_v24, %v1344_v23  ;;  %v1683_v61 = vpop.f32.mrf.mxu2 }
 0x221   : > { %v3340_v28 = vadd.f32 %v1401_v22, %v1373_v16 }
 0x222   : > { %v1404_v26 = vpop.f32.mrf.mxu3 }
 0x224   : > { %v1346_v17 = vpop.f32.mrf.mxu1 }
 0x225   : > { %v1347_v30 = vadd.f32 %v1346_v17, %v3266_v4 }
 0x227   : > { %v1376_v37 = vadd.f32 %v1375_v3, %v1347_v30  ;;  %v1686_v0 = vpop.f32.mrf.mxu2 }
 0x229   : > { %v3349_v35 = vadd.f32 %v1404_v26, %v1376_v37 }
 0x22a   : > { %v1406_v38 = vpop.f32.mrf.mxu3 }
 0x22c   : > { %v1348_v40 = vpop.f32.mrf.mxu1 }
 0x22d   : > { %v1349_v41 = vadd.f32 %v1348_v40, %v1176_v39 }
 0x22f   : > { %v1378_v43 = vadd.f32 %v1377_v13, %v1349_v41  ;;  %v1688_v23 = vpop.f32.mrf.mxu2 }
 0x231   : > { %v3352_v4 = vadd.f32 %v1406_v38, %v1378_v43 }
 0x232   : > { %v1705_v46 = vpop.f32.mrf.mxu3 }
 0x234   : > { %v1647_v32 = vpop.f32.mrf.mxu1 }
 0x235   : > { %v1677_v47 = vadd.f32 %v1676_v31, %v1647_v32 }
 0x237   : > { %v1706_v18 = vadd.f32 %v1705_v46, %v1677_v47  ;;  %v1691_v30 = vpop.f32.mrf.mxu2 }
 0x239   : > { %v1725_v55 = vadd.f32 %v1706_v18, %v3291_v45 }
 0x23a   : > { %v1707_v51 = vpop.f32.mrf.mxu3 }
 0x23b   : > { %v1737_v60 = vadd.f32 %v2741_v25, %v1725_v55 }
 0x23c   : > { %v1649_v53 = vpop.f32.mrf.mxu1 }
 0x23d   : > { %v1679_v34 = vadd.f32 %v1678_v44, %v1649_v53  ;;  %v1745_v63 = vmax.f32 %v1737_v60, 0.0  ;;  %v2743_v60 = vld [vmem:[%s3394_s6] ss:$0 sm:$0xff] }
 0x23f   : > { %v1708_v59 = vadd.f32 %v1707_v51, %v1679_v34  ;;  %v1693_v43 = vpop.f32.mrf.mxu2 }
 0x241   : > { %v1726_v42 = vadd.f32 %v1708_v59, %v3300_v52 }
 0x242   : > { %v1710_v49 = vpop.f32.mrf.mxu3 }
 0x243   : > { %v1738_v56 = vadd.f32 %v2741_v25, %v1726_v42 }
 0x244   : > { %v1652_v24 = vpop.f32.mrf.mxu1 }
 0x245   : > { %v1746_v1 = vmax.f32 %v1738_v56, 0.0  ;;  %v1682_v2 = vadd.f32 %v1681_v48, %v1652_v24 }
 0x247   : > { %v1753_v45 = vpack.c.bf16 %v1746_v1, %v1745_v63  ;;  %v1711_v5 = vadd.f32 %v1710_v49, %v1682_v2 }
 0x249   : > { %1833 = vmatmul.bf16.vlgmr.msrb.gmra.mxu1 %v1753_v45  ;;  %v1727_v57 = vadd.f32 %v1711_v5, %v3311_v62 }
 0x24a   : > { %v1712_v7 = vpop.f32.mrf.mxu3 }
 0x24b   : > { %v1739_v8 = vadd.f32 %v2741_v25, %v1727_v57 }
 0x24c   : > { %v1654_v58 = vpop.f32.mrf.mxu1 }
 0x24d   : > { %v1684_v3 = vadd.f32 %v1683_v61, %v1654_v58  ;;  %v1747_v22 = vmax.f32 %v1739_v8, 0.0 }
 0x24f   : > { %v1713_v52 = vadd.f32 %v1712_v7, %v1684_v3 }
 0x251   : > { %v1728_v6 = vadd.f32 %v1713_v52, %v3320_v54 }
 0x252   : > { %v1715_v11 = vpop.f32.mrf.mxu3 }
 0x253   : > { %v1740_v9 = vadd.f32 %v2741_v25, %v1728_v6 }
 0x254   : > { %v1657_v19 = vpop.f32.mrf.mxu1 }
 0x255   : > { %v1748_v14 = vmax.f32 %v1740_v9, 0.0  ;;  %v1687_v13 = vadd.f32 %v1686_v0, %v1657_v19 }
 0x257   : > { %v1754_v21 = vpack.c.bf16 %v1748_v14, %v1747_v22  ;;  %v1716_v27 = vadd.f32 %v1715_v11, %v1687_v13 }
 0x259   : > { %1838 = vmatmul.bf16.gmra.mxu1 %v1754_v21  ;;  %v1729_v16 = vadd.f32 %v1716_v27, %v3331_v20 }
 0x25a   : > { %v1717_v10 = vpop.f32.mrf.mxu3 }
 0x25b   : > { %v1741_v17 = vadd.f32 %v2741_v25, %v1729_v16 }
 0x25c   : > { %v1659_v62 = vpop.f32.mrf.mxu1 }
 0x25d   : > { %v1689_v26 = vadd.f32 %v1688_v23, %v1659_v62  ;;  %v1749_v33 = vmax.f32 %v1741_v17, 0.0 }
 0x25f   : > { %v1718_v29 = vadd.f32 %v1717_v10, %v1689_v26 }
 0x261   : > { %v1730_v54 = vadd.f32 %v1718_v29, %v3340_v28 }
 0x262   : > { %v1720_v37 = vpop.f32.mrf.mxu3 }
 0x263   : > { %v1742_v31 = vadd.f32 %v2741_v25, %v1730_v54 }
 0x264   : > { %v1662_v36 = vpop.f32.mrf.mxu1 }
 0x265   : > { %v1750_v38 = vmax.f32 %v1742_v31, 0.0  ;;  %v1692_v39 = vadd.f32 %v1691_v30, %v1662_v36 }
 0x267   : > { %v1755_v40 = vpack.c.bf16 %v1750_v38, %v1749_v33  ;;  %v1721_v41 = vadd.f32 %v1720_v37, %v1692_v39 }
 0x269   : > { %1843 = vmatmul.bf16.gmra.mxu1 %v1755_v40  ;;  %v1731_v46 = vadd.f32 %v1721_v41, %v3349_v35  ;;  %v2742_v35 = vld [vmem:[%s3396_s8] ss:$0 sm:$0xff] }
 0x26a   : > { %v1722_v15 = vpop.f32.mrf.mxu3 }
 0x26b   : > { %v1743_v47 = vadd.f32 %v2741_v25, %v1731_v46  ;;  %v1931_v55 = vpop.f32.mrf.mxu2 }
 0x26c   : > { %v1664_v44 = vpop.f32.mrf.mxu1  ;;  %v1932_v49 = vadd.f32 %v2742_v35, %v1931_v55 }
 0x26d   : > { %v1694_v20 = vadd.f32 %v1693_v43, %v1664_v44  ;;  %v1751_v48 = vmax.f32 %v1743_v47, 0.0 }
 0x26f   : > { %v1723_v32 = vadd.f32 %v1722_v15, %v1694_v20 }
 0x271   : > { %v1732_v28 = vadd.f32 %v1723_v32, %v3352_v4 }
 0x273   : > { %v1744_v18 = vadd.f32 %v2741_v25, %v1732_v28  ;;  %v1933_v34 = vpop.f32.mrf.mxu2 }
 0x274   : > { %v1934_v56 = vadd.f32 %v2742_v35, %v1933_v34 }
 0x275   : > { %v1752_v51 = vmax.f32 %v1744_v18, 0.0 }
 0x277   : > { %v1756_v53 = vpack.c.bf16 %v1752_v51, %v1751_v48 }
 0x279   : > { %1848 = vmatmul.bf16.gmra.mxu1 %v1756_v53 }
 0x27b   : > { %v1936_v42 = vpop.f32.mrf.mxu2 }
 0x27c   : > { %v1937_v7 = vadd.f32 %v2742_v35, %v1936_v42 }
 0x283   : > { %v1938_v2 = vpop.f32.mrf.mxu2 }
 0x284   : > { %v1939_v52 = vadd.f32 %v2742_v35, %v1938_v2 }
 0x28b   : > { %v1941_v3 = vpop.f32.mrf.mxu2 }
 0x28c   : > { %v1942_v14 = vadd.f32 %v2742_v35, %v1941_v3 }
 0x293   : > { %v1943_v22 = vpop.f32.mrf.mxu2 }
 0x294   : > { %v1944_v27 = vadd.f32 %v2742_v35, %v1943_v22 }
 0x29b   : > { %v1946_v16 = vpop.f32.mrf.mxu2 }
 0x29c   : > { %v1947_v30 = vadd.f32 %v2742_v35, %v1946_v16 }
 0x2a3   : > { %v1948_v36 = vpop.f32.mrf.mxu2 }
 0x2a4   : > { %v1949_v38 = vadd.f32 %v2742_v35, %v1948_v36 }
 0x2c6   : > { %v1834_v59 = vpop.f32.mrf.mxu1 }
 0x2c7   : > { %v1835_v4 = vadd.f32 %v2743_v60, %v1834_v59 }
 0x2c9   : > { %v1951_v50 = vadd.f32 %v1932_v49, %v1835_v4 }
 0x2cb   : > { %v1959_v63 = vmax.f32 %v1951_v50, 0.0 }
 0x2ce   : > { %v1836_v25 = vpop.f32.mrf.mxu1 }
 0x2cf   : > { %v1837_v61 = vadd.f32 %v2743_v60, %v1836_v25 }
 0x2d1   : > { %v1952_v24 = vadd.f32 %v1934_v56, %v1837_v61 }
 0x2d3   : > { %v1960_v1 = vmax.f32 %v1952_v24, 0.0 }
 0x2d5   : > { %v2711_v45 = vpack.c.bf16 %v1960_v1, %v1959_v63 }
 0x2d6   : > { %v1839_v5 = vpop.f32.mrf.mxu1 }
 0x2d7   : > { %2712 = vst [vmem:[%s3379_s19] sm:$0xff] %v2711_v45   ;;  %v1840_v58 = vadd.f32 %v2743_v60, %v1839_v5 }
 0x2d9   : > { %v1953_v0 = vadd.f32 %v1937_v7, %v1840_v58 }
 0x2db   : > { %v1961_v11 = vmax.f32 %v1953_v0, 0.0 }
 0x2de   : > { %v1841_v57 = vpop.f32.mrf.mxu1 }
 0x2df   : > { %v1842_v8 = vadd.f32 %v2743_v60, %v1841_v57 }
 0x2e1   : > { %v1954_v6 = vadd.f32 %v1939_v52, %v1842_v8 }
 0x2e3   : > { %v1962_v12 = vmax.f32 %v1954_v6, 0.0 }
 0x2e5   : > { %v2716_v9 = vpack.c.bf16 %v1962_v12, %v1961_v11 }
 0x2e6   : > { %v1844_v19 = vpop.f32.mrf.mxu1 }
 0x2e7   : > { %2728 = vst [vmem:[%s3379_s19 + $0x8] sm:$0xff] %v2716_v9   ;;  %v1845_v13 = vadd.f32 %v2743_v60, %v1844_v19 }
 0x2e9   : > { %v1955_v23 = vadd.f32 %v1942_v14, %v1845_v13 }
 0x2eb   : > { %v1963_v26 = vmax.f32 %v1955_v23, 0.0 }
 0x2ee   : > { %v1846_v21 = vpop.f32.mrf.mxu1 }
 0x2ef   : > { %v1847_v10 = vadd.f32 %v2743_v60, %v1846_v21 }
 0x2f1   : > { %v1956_v62 = vadd.f32 %v1944_v27, %v1847_v10 }
 0x2f3   : > { %v1964_v29 = vmax.f32 %v1956_v62, 0.0 }
 0x2f5   : > { %v2721_v17 = vpack.c.bf16 %v1964_v29, %v1963_v26 }
 0x2f6   : > { %v1849_v54 = vpop.f32.mrf.mxu1 }
 0x2f7   : > { %2729 = vst [vmem:[%s3379_s19 + $0x10] sm:$0xff] %v2721_v17   ;;  %v1850_v31 = vadd.f32 %v2743_v60, %v1849_v54 }
 0x2f9   : > { %v1957_v33 = vadd.f32 %v1947_v30, %v1850_v31 }
 0x2fb   : > { %v1965_v41 = vmax.f32 %v1957_v33, 0.0 }
 0x2fe   : > { %v1851_v37 = vpop.f32.mrf.mxu1 }
 0x2ff   : > { %v1852_v39 = vadd.f32 %v2743_v60, %v1851_v37 }
 0x301   : > { %v1958_v40 = vadd.f32 %v1949_v38, %v1852_v39 }
 0x303   : > { %v1966_v43 = vmax.f32 %v1958_v40, 0.0 }
 0x305   : > { %v2726_v44 = vpack.c.bf16 %v1966_v43, %v1965_v41 }
 0x307   : > { %2730 = vst [vmem:[%s3379_s19 + $0x18] sm:$0xff] %v2726_v44  }
 0x308 PF: > { %s19_s30 = sadd.s32 1, %s2754_s30  }
 0x309   : > { %p16_p5 = scmp.ge.s32.totalorder %s19_s30, 4  }
 0x30b   :  { %18 = sbr.rel (!%p16_p5) target bundleno = 1 (0x1), region = 99 }

</bundles_post_ra>
